<compile_context>
chip_gen: v7x
topology: tpu7x:2x2x1
jax: 0.10.0
libtpu: 0.0.40
codegen_flags: <defaults>
</compile_context>

<pallas_src>
import math

import jax
import jax.numpy as jnp
from jax.experimental import pallas as pl
from jax.experimental.pallas import tpu as pltpu


def gc_blockv2_kernel(x_ref, adj1_ref, w1_ref, adj2_ref, w2_ref, vec_ref, o_ref):
    vecs = vec_ref[...]                       # (6, F) packed params, single DMA
    b1, g1, bt1 = vecs[0:1], vecs[1:2], vecs[2:3]
    b2, g2, bt2 = vecs[3:4], vecs[4:5], vecs[5:6]

    def gc_ln_relu(h, adj_ref, w_ref, bias, gamma, beta):
        # Graph conv: adj @ (h @ W) + bias.  bf16 operands, f32 MXU accumulate.
        s = jnp.dot(h.astype(w_ref.dtype), w_ref[...],
                    preferred_element_type=jnp.float32)
        y = jnp.dot(adj_ref[...], s.astype(adj_ref.dtype),
                    preferred_element_type=jnp.float32)
        y = y + bias
        # LayerNorm over features (eps=1e-5, biased variance, two-pass stats).
        mean = jnp.mean(y, axis=-1, keepdims=True)
        d = y - mean
        var = jnp.mean(d * d, axis=-1, keepdims=True)
        y = d * jax.lax.rsqrt(var + 1e-5)
        y = y * gamma + beta
        return jnp.maximum(y, 0.0)            # ReLU; dropout = identity (eval)

    bb = x_ref.shape[0]                       # static: batches per grid step (<= cap)
    for b in range(bb):                       # small, unrolled
        y = gc_ln_relu(x_ref[b], adj1_ref, w1_ref, b1, g1, bt1)
        y = gc_ln_relu(y, adj2_ref, w2_ref, b2, g2, bt2)
        # Residual: re-read x from VMEM here (short vreg live range).
        o_ref[b] = y + x_ref[b]


def prepare_params(params, *, matmul_dtype=jnp.bfloat16):
    """One-time parameter prep (call ONCE, outside the per-step forward):
    cast matmul operands to the MXU dtype and pack the six (F,) vectors
    (bias/gamma/beta x 2) into a single (6, F) f32 array -> one DMA."""
    vecs = jnp.stack([params[k].astype(jnp.float32)
                      for k in ("b1", "g1", "bt1", "b2", "g2", "bt2")])
    return {
        "adj1": params["adj1"].astype(matmul_dtype),
        "adj2": params["adj2"].astype(matmul_dtype),
        "w1":   params["w1"].astype(matmul_dtype),
        "w2":   params["w2"].astype(matmul_dtype),
        "vecs": vecs,
    }


def _num_tensorcores():
    """Best-effort TensorCore count (v5e/v6e: 1, v7x: 2).  Falls back to 1."""
    try:
        info = pltpu.get_tpu_info()
        for attr in ("num_cores", "num_tensorcores", "tensorcores_per_chip",
                     "core_count"):
            v = getattr(info, attr, None)
            if isinstance(v, int) and v > 0:
                return v
    except Exception:
        pass
    try:
        return int(getattr(jax.devices()[0], "num_cores", 1) or 1)
    except Exception:
        return 1


def gc_blockv2(x, prepared, *, bb_cap=8, num_cores=None):
    """x: (B, node_n, F) float32.  prepared: output of prepare_params().

    bb = batches folded per grid step.  Capped at bb_cap so per-step VMEM is
    bounded and the x / output DMAs pipeline across grid steps for large B;
    additionally bounded so the "parallel" grid axis has at least one step per
    TensorCore (keeps both v7x cores busy)."""
    B, node_n, F = x.shape
    if num_cores is None:
        num_cores = _num_tensorcores()

    bb = min(B, bb_cap)
    if num_cores > 1 and B >= num_cores:
        bb = min(bb, max(1, B // num_cores))
    while B % bb:                              # bb must divide B
        bb -= 1
    num_blocks = B // bb

    const2 = lambda i: (0, 0)
    return pl.pallas_call(
        gc_blockv2_kernel,
        out_shape=jax.ShapeDtypeStruct((B, node_n, F), x.dtype),
        grid_spec=pltpu.PrefetchScalarGridSpec(
            num_scalar_prefetch=0,
            grid=(num_blocks,),
            in_specs=[
                pl.BlockSpec((bb, node_n, F), lambda i: (i, 0, 0)),   # x slab
                pl.BlockSpec((node_n, node_n), const2),               # adj1
                pl.BlockSpec((F, F), const2),                         # w1
                pl.BlockSpec((node_n, node_n), const2),               # adj2
                pl.BlockSpec((F, F), const2),                         # w2
                pl.BlockSpec((6, F), const2),                         # packed vecs
            ],
            out_specs=pl.BlockSpec((bb, node_n, F), lambda i: (i, 0, 0)),
        ),
        compiler_params=pltpu.CompilerParams(
            dimension_semantics=("parallel",)),
    )(x, prepared["adj1"], prepared["w1"], prepared["adj2"],
      prepared["w2"], prepared["vecs"])


def init_params(key, in_features, node_n):
    """Matches GraphConvolution.reset_parameters (uniform(-stdv, stdv),
    stdv = 1/sqrt(out_features)); LayerNorm gamma=1, beta=0."""
    stdv = 1.0 / math.sqrt(in_features)
    ks = jax.random.split(key, 6)
    u = lambda k, shape: jax.random.uniform(
        k, shape, dtype=jnp.float32, minval=-stdv, maxval=stdv)
    return {
        "w1":   u(ks[0], (in_features, in_features)),
        "adj1": u(ks[1], (node_n, node_n)),
        "b1":   u(ks[2], (in_features,)),
        "g1":   jnp.ones((in_features,), jnp.float32),
        "bt1":  jnp.zeros((in_features,), jnp.float32),
        "w2":   u(ks[3], (in_features, in_features)),
        "adj2": u(ks[4], (node_n, node_n)),
        "b2":   u(ks[5], (in_features,)),
        "g2":   jnp.ones((in_features,), jnp.float32),
        "bt2":  jnp.zeros((in_features,), jnp.float32),
    }


def _reference(x, p, matmul_dtype=jnp.float32):
    """Pure-JAX reference of GC_BlockV2.forward (eval mode).  With
    matmul_dtype=bfloat16 it mirrors the kernel's bf16-operand / f32-accumulate
    matmul precision for a tight comparison."""
    c = lambda a: a.astype(matmul_dtype)

    def ln(y, g, b):
        m = jnp.mean(y, axis=-1, keepdims=True)
        v = jnp.mean((y - m) ** 2, axis=-1, keepdims=True)
        return (y - m) / jnp.sqrt(v + 1e-5) * g + b

    def gc(h, w, adj, bias):
        s = jnp.matmul(c(h), c(w), preferred_element_type=jnp.float32)
        y = jnp.einsum("nm,bmf->bnf", c(adj), c(s),
                       preferred_element_type=jnp.float32)
        return y + bias

    y = jnp.maximum(ln(gc(x, p["w1"], p["adj1"], p["b1"]), p["g1"], p["bt1"]), 0.0)
    y = jnp.maximum(ln(gc(y, p["w2"], p["adj2"], p["b2"]), p["g2"], p["bt2"]), 0.0)
    return y + x


if __name__ == "__main__":
    B, node_n, F = 2, 57, 32
    key = jax.random.PRNGKey(0)
    kx, kp = jax.random.split(key)

    x = jax.random.normal(kx, (B, node_n, F), dtype=jnp.float32)
    params = init_params(kp, F, node_n)

    # One-time prep (outside the per-call hot path).
    prepared = prepare_params(params)

    fwd = jax.jit(gc_blockv2)
    out = jax.block_until_ready(fwd(x, prepared))
    assert out.shape == (B, node_n, F)

    # Tight check vs. a matched-precision (bf16-operand, f32-accumulate) reference.
    ref_bf16 = _reference(x, params, matmul_dtype=jnp.bfloat16)
    assert jnp.allclose(out, ref_bf16, atol=2e-3, rtol=2e-3)

    # Sanity bound vs. the full-f32 PyTorch-equivalent reference (bf16 MXU
    # operands introduce O(1e-2) drift, accepted per perf review).
    ref_f32 = _reference(x, params, matmul_dtype=jnp.float32)
    assert jnp.allclose(out, ref_f32, atol=1e-1, rtol=1e-1)

    print("KERNEL_OK")
</pallas_src>

<mosaic_0001>
module attributes {stable_mosaic.version = 11 : i64} {
  func.func @gc_blockv2_kernel(%arg0: i32, %arg1: memref<2x57x32xf32, #tpu.memory_space<vmem>>, %arg2: memref<57x57xbf16, #tpu.memory_space<vmem>>, %arg3: memref<32x32xbf16, #tpu.memory_space<vmem>>, %arg4: memref<57x57xbf16, #tpu.memory_space<vmem>>, %arg5: memref<32x32xbf16, #tpu.memory_space<vmem>>, %arg6: memref<6x32xf32, #tpu.memory_space<vmem>>, %arg7: memref<2x57x32xf32, #tpu.memory_space<vmem>>) attributes {dimension_semantics = [#tpu.dimension_semantics<parallel>], iteration_bounds = array<i64: 1>, scalar_prefetch = 0 : i64, scratch_operands = 0 : i64, tpu.core_type = #tpu.core_type<tc>, window_params = [{transform_indices = @transform_0, window_bounds = array<i64: 2, 57, 32>}, {pipeline_mode = #tpu.pipeline_mode<synchronous>, transform_indices = @transform_1, window_bounds = array<i64: 57, 57>}, {pipeline_mode = #tpu.pipeline_mode<synchronous>, transform_indices = @transform_2, window_bounds = array<i64: 32, 32>}, {pipeline_mode = #tpu.pipeline_mode<synchronous>, transform_indices = @transform_3, window_bounds = array<i64: 57, 57>}, {pipeline_mode = #tpu.pipeline_mode<synchronous>, transform_indices = @transform_4, window_bounds = array<i64: 32, 32>}, {pipeline_mode = #tpu.pipeline_mode<synchronous>, transform_indices = @transform_5, window_bounds = array<i64: 6, 32>}, {transform_indices = @transform_6, window_bounds = array<i64: 2, 57, 32>}]} {
    %c0 = arith.constant 0 : index
    %c0_0 = arith.constant 0 : index
    %0 = vector.load %arg6[%c0, %c0_0] : memref<6x32xf32, #tpu.memory_space<vmem>>, vector<6x32xf32>
    %1 = vector.extract_strided_slice %0 {offsets = [0, 0], sizes = [1, 32], strides = [1, 1]} : vector<6x32xf32> to vector<1x32xf32>
    %2 = vector.extract_strided_slice %0 {offsets = [1, 0], sizes = [1, 32], strides = [1, 1]} : vector<6x32xf32> to vector<1x32xf32>
    %3 = vector.extract_strided_slice %0 {offsets = [2, 0], sizes = [1, 32], strides = [1, 1]} : vector<6x32xf32> to vector<1x32xf32>
    %4 = vector.extract_strided_slice %0 {offsets = [3, 0], sizes = [1, 32], strides = [1, 1]} : vector<6x32xf32> to vector<1x32xf32>
    %5 = vector.extract_strided_slice %0 {offsets = [4, 0], sizes = [1, 32], strides = [1, 1]} : vector<6x32xf32> to vector<1x32xf32>
    %6 = vector.extract_strided_slice %0 {offsets = [5, 0], sizes = [1, 32], strides = [1, 1]} : vector<6x32xf32> to vector<1x32xf32>
    %c0_1 = arith.constant 0 : index
    %c0_2 = arith.constant 0 : index
    %c0_3 = arith.constant 0 : index
    %7 = vector.load %arg1[%c0_1, %c0_2, %c0_3] : memref<2x57x32xf32, #tpu.memory_space<vmem>>, vector<1x57x32xf32>
    %8 = vector.shape_cast %7 : vector<1x57x32xf32> to vector<57x32xf32>
    %9 = arith.truncf %8 : vector<57x32xf32> to vector<57x32xbf16>
    %c0_4 = arith.constant 0 : index
    %c0_5 = arith.constant 0 : index
    %10 = vector.load %arg3[%c0_4, %c0_5] : memref<32x32xbf16, #tpu.memory_space<vmem>>, vector<32x32xbf16>
    %cst = arith.constant dense<0.000000e+00> : vector<57x32xf32>
    %11 = tpu.matmul %9, %10, %cst {dimension_numbers = #tpu.dot_dimension_numbers<[1], [0], [0], [1], [0, 0, 1, 1], [], []>} : vector<57x32xbf16>, vector<32x32xbf16>, vector<57x32xf32> -> vector<57x32xf32>
    %c0_6 = arith.constant 0 : index
    %c0_7 = arith.constant 0 : index
    %12 = vector.load %arg2[%c0_6, %c0_7] : memref<57x57xbf16, #tpu.memory_space<vmem>>, vector<57x57xbf16>
    %13 = arith.truncf %11 : vector<57x32xf32> to vector<57x32xbf16>
    %cst_8 = arith.constant dense<0.000000e+00> : vector<57x32xf32>
    %14 = tpu.matmul %12, %13, %cst_8 {dimension_numbers = #tpu.dot_dimension_numbers<[1], [0], [0], [1], [0, 0, 1, 1], [], []>} : vector<57x57xbf16>, vector<57x32xbf16>, vector<57x32xf32> -> vector<57x32xf32>
    %15 = vector.broadcast %1 : vector<1x32xf32> to vector<57x32xf32>
    %16 = arith.addf %14, %15 : vector<57x32xf32>
    %cst_9 = arith.constant dense<0.000000e+00> : vector<57xf32>
    %17 = vector.multi_reduction <add>, %16, %cst_9 [1] : vector<57x32xf32> to vector<57xf32>
    %18 = vector.shape_cast %17 : vector<57xf32> to vector<57x1xf32>
    %cst_10 = arith.constant 3.200000e+01 : f32
    %19 = vector.broadcast %cst_10 : f32 to vector<57x1xf32>
    %20 = arith.divf %18, %19 : vector<57x1xf32>
    %21 = vector.broadcast %20 : vector<57x1xf32> to vector<57x32xf32>
    %22 = arith.subf %16, %21 : vector<57x32xf32>
    %23 = arith.mulf %22, %22 : vector<57x32xf32>
    %cst_11 = arith.constant dense<0.000000e+00> : vector<57xf32>
    %24 = vector.multi_reduction <add>, %23, %cst_11 [1] : vector<57x32xf32> to vector<57xf32>
    %25 = vector.shape_cast %24 : vector<57xf32> to vector<57x1xf32>
    %cst_12 = arith.constant 3.200000e+01 : f32
    %26 = vector.broadcast %cst_12 : f32 to vector<57x1xf32>
    %27 = arith.divf %25, %26 : vector<57x1xf32>
    %cst_13 = arith.constant 9.99999974E-6 : f32
    %28 = vector.broadcast %cst_13 : f32 to vector<57x1xf32>
    %29 = arith.addf %27, %28 : vector<57x1xf32>
    %30 = math.rsqrt %29 : vector<57x1xf32>
    %31 = vector.broadcast %30 : vector<57x1xf32> to vector<57x32xf32>
    %32 = arith.mulf %22, %31 : vector<57x32xf32>
    %33 = vector.broadcast %2 : vector<1x32xf32> to vector<57x32xf32>
    %34 = arith.mulf %32, %33 : vector<57x32xf32>
    %35 = vector.broadcast %3 : vector<1x32xf32> to vector<57x32xf32>
    %36 = arith.addf %34, %35 : vector<57x32xf32>
    %cst_14 = arith.constant 0.000000e+00 : f32
    %37 = vector.broadcast %cst_14 : f32 to vector<57x32xf32>
    %38 = arith.maximumf %36, %37 : vector<57x32xf32>
    %39 = arith.truncf %38 : vector<57x32xf32> to vector<57x32xbf16>
    %c0_15 = arith.constant 0 : index
    %c0_16 = arith.constant 0 : index
    %40 = vector.load %arg5[%c0_15, %c0_16] : memref<32x32xbf16, #tpu.memory_space<vmem>>, vector<32x32xbf16>
    %cst_17 = arith.constant dense<0.000000e+00> : vector<57x32xf32>
    %41 = tpu.matmul %39, %40, %cst_17 {dimension_numbers = #tpu.dot_dimension_numbers<[1], [0], [0], [1], [0, 0, 1, 1], [], []>} : vector<57x32xbf16>, vector<32x32xbf16>, vector<57x32xf32> -> vector<57x32xf32>
    %c0_18 = arith.constant 0 : index
    %c0_19 = arith.constant 0 : index
    %42 = vector.load %arg4[%c0_18, %c0_19] : memref<57x57xbf16, #tpu.memory_space<vmem>>, vector<57x57xbf16>
    %43 = arith.truncf %41 : vector<57x32xf32> to vector<57x32xbf16>
    %cst_20 = arith.constant dense<0.000000e+00> : vector<57x32xf32>
    %44 = tpu.matmul %42, %43, %cst_20 {dimension_numbers = #tpu.dot_dimension_numbers<[1], [0], [0], [1], [0, 0, 1, 1], [], []>} : vector<57x57xbf16>, vector<57x32xbf16>, vector<57x32xf32> -> vector<57x32xf32>
    %45 = vector.broadcast %4 : vector<1x32xf32> to vector<57x32xf32>
    %46 = arith.addf %44, %45 : vector<57x32xf32>
    %cst_21 = arith.constant dense<0.000000e+00> : vector<57xf32>
    %47 = vector.multi_reduction <add>, %46, %cst_21 [1] : vector<57x32xf32> to vector<57xf32>
    %48 = vector.shape_cast %47 : vector<57xf32> to vector<57x1xf32>
    %cst_22 = arith.constant 3.200000e+01 : f32
    %49 = vector.broadcast %cst_22 : f32 to vector<57x1xf32>
    %50 = arith.divf %48, %49 : vector<57x1xf32>
    %51 = vector.broadcast %50 : vector<57x1xf32> to vector<57x32xf32>
    %52 = arith.subf %46, %51 : vector<57x32xf32>
    %53 = arith.mulf %52, %52 : vector<57x32xf32>
    %cst_23 = arith.constant dense<0.000000e+00> : vector<57xf32>
    %54 = vector.multi_reduction <add>, %53, %cst_23 [1] : vector<57x32xf32> to vector<57xf32>
    %55 = vector.shape_cast %54 : vector<57xf32> to vector<57x1xf32>
    %cst_24 = arith.constant 3.200000e+01 : f32
    %56 = vector.broadcast %cst_24 : f32 to vector<57x1xf32>
    %57 = arith.divf %55, %56 : vector<57x1xf32>
    %cst_25 = arith.constant 9.99999974E-6 : f32
    %58 = vector.broadcast %cst_25 : f32 to vector<57x1xf32>
    %59 = arith.addf %57, %58 : vector<57x1xf32>
    %60 = math.rsqrt %59 : vector<57x1xf32>
    %61 = vector.broadcast %60 : vector<57x1xf32> to vector<57x32xf32>
    %62 = arith.mulf %52, %61 : vector<57x32xf32>
    %63 = vector.broadcast %5 : vector<1x32xf32> to vector<57x32xf32>
    %64 = arith.mulf %62, %63 : vector<57x32xf32>
    %65 = vector.broadcast %6 : vector<1x32xf32> to vector<57x32xf32>
    %66 = arith.addf %64, %65 : vector<57x32xf32>
    %cst_26 = arith.constant 0.000000e+00 : f32
    %67 = vector.broadcast %cst_26 : f32 to vector<57x32xf32>
    %68 = arith.maximumf %66, %67 : vector<57x32xf32>
    %c0_27 = arith.constant 0 : index
    %c0_28 = arith.constant 0 : index
    %c0_29 = arith.constant 0 : index
    %69 = vector.load %arg1[%c0_27, %c0_28, %c0_29] : memref<2x57x32xf32, #tpu.memory_space<vmem>>, vector<1x57x32xf32>
    %70 = vector.shape_cast %69 : vector<1x57x32xf32> to vector<57x32xf32>
    %71 = arith.addf %68, %70 : vector<57x32xf32>
    %c0_30 = arith.constant 0 : index
    %c0_31 = arith.constant 0 : index
    %c0_32 = arith.constant 0 : index
    %72 = vector.load %arg7[%c0_30, %c0_31, %c0_32] : memref<2x57x32xf32, #tpu.memory_space<vmem>>, vector<1x57x32xf32>
    %73 = vector.shape_cast %72 : vector<1x57x32xf32> to vector<57x32xf32>
    %74 = vector.shape_cast %71 : vector<57x32xf32> to vector<1x57x32xf32>
    tpu.vector_store %arg7[%c0_30, %c0_31, %c0_32], %74 {strides = array<i32>} : memref<2x57x32xf32, #tpu.memory_space<vmem>>, vector<1x57x32xf32>,
    %c1 = arith.constant 1 : index
    %c0_33 = arith.constant 0 : index
    %c0_34 = arith.constant 0 : index
    %75 = vector.load %arg1[%c1, %c0_33, %c0_34] : memref<2x57x32xf32, #tpu.memory_space<vmem>>, vector<1x57x32xf32>
    %76 = vector.shape_cast %75 : vector<1x57x32xf32> to vector<57x32xf32>
    %77 = arith.truncf %76 : vector<57x32xf32> to vector<57x32xbf16>
    %c0_35 = arith.constant 0 : index
    %c0_36 = arith.constant 0 : index
    %78 = vector.load %arg3[%c0_35, %c0_36] : memref<32x32xbf16, #tpu.memory_space<vmem>>, vector<32x32xbf16>
    %cst_37 = arith.constant dense<0.000000e+00> : vector<57x32xf32>
    %79 = tpu.matmul %77, %78, %cst_37 {dimension_numbers = #tpu.dot_dimension_numbers<[1], [0], [0], [1], [0, 0, 1, 1], [], []>} : vector<57x32xbf16>, vector<32x32xbf16>, vector<57x32xf32> -> vector<57x32xf32>
    %c0_38 = arith.constant 0 : index
    %c0_39 = arith.constant 0 : index
    %80 = vector.load %arg2[%c0_38, %c0_39] : memref<57x57xbf16, #tpu.memory_space<vmem>>, vector<57x57xbf16>
    %81 = arith.truncf %79 : vector<57x32xf32> to vector<57x32xbf16>
    %cst_40 = arith.constant dense<0.000000e+00> : vector<57x32xf32>
    %82 = tpu.matmul %80, %81, %cst_40 {dimension_numbers = #tpu.dot_dimension_numbers<[1], [0], [0], [1], [0, 0, 1, 1], [], []>} : vector<57x57xbf16>, vector<57x32xbf16>, vector<57x32xf32> -> vector<57x32xf32>
    %83 = vector.broadcast %1 : vector<1x32xf32> to vector<57x32xf32>
    %84 = arith.addf %82, %83 : vector<57x32xf32>
    %cst_41 = arith.constant dense<0.000000e+00> : vector<57xf32>
    %85 = vector.multi_reduction <add>, %84, %cst_41 [1] : vector<57x32xf32> to vector<57xf32>
    %86 = vector.shape_cast %85 : vector<57xf32> to vector<57x1xf32>
    %cst_42 = arith.constant 3.200000e+01 : f32
    %87 = vector.broadcast %cst_42 : f32 to vector<57x1xf32>
    %88 = arith.divf %86, %87 : vector<57x1xf32>
    %89 = vector.broadcast %88 : vector<57x1xf32> to vector<57x32xf32>
    %90 = arith.subf %84, %89 : vector<57x32xf32>
    %91 = arith.mulf %90, %90 : vector<57x32xf32>
    %cst_43 = arith.constant dense<0.000000e+00> : vector<57xf32>
    %92 = vector.multi_reduction <add>, %91, %cst_43 [1] : vector<57x32xf32> to vector<57xf32>
    %93 = vector.shape_cast %92 : vector<57xf32> to vector<57x1xf32>
    %cst_44 = arith.constant 3.200000e+01 : f32
    %94 = vector.broadcast %cst_44 : f32 to vector<57x1xf32>
    %95 = arith.divf %93, %94 : vector<57x1xf32>
    %cst_45 = arith.constant 9.99999974E-6 : f32
    %96 = vector.broadcast %cst_45 : f32 to vector<57x1xf32>
    %97 = arith.addf %95, %96 : vector<57x1xf32>
    %98 = math.rsqrt %97 : vector<57x1xf32>
    %99 = vector.broadcast %98 : vector<57x1xf32> to vector<57x32xf32>
    %100 = arith.mulf %90, %99 : vector<57x32xf32>
    %101 = vector.broadcast %2 : vector<1x32xf32> to vector<57x32xf32>
    %102 = arith.mulf %100, %101 : vector<57x32xf32>
    %103 = vector.broadcast %3 : vector<1x32xf32> to vector<57x32xf32>
    %104 = arith.addf %102, %103 : vector<57x32xf32>
    %cst_46 = arith.constant 0.000000e+00 : f32
    %105 = vector.broadcast %cst_46 : f32 to vector<57x32xf32>
    %106 = arith.maximumf %104, %105 : vector<57x32xf32>
    %107 = arith.truncf %106 : vector<57x32xf32> to vector<57x32xbf16>
    %c0_47 = arith.constant 0 : index
    %c0_48 = arith.constant 0 : index
    %108 = vector.load %arg5[%c0_47, %c0_48] : memref<32x32xbf16, #tpu.memory_space<vmem>>, vector<32x32xbf16>
    %cst_49 = arith.constant dense<0.000000e+00> : vector<57x32xf32>
    %109 = tpu.matmul %107, %108, %cst_49 {dimension_numbers = #tpu.dot_dimension_numbers<[1], [0], [0], [1], [0, 0, 1, 1], [], []>} : vector<57x32xbf16>, vector<32x32xbf16>, vector<57x32xf32> -> vector<57x32xf32>
    %c0_50 = arith.constant 0 : index
    %c0_51 = arith.constant 0 : index
    %110 = vector.load %arg4[%c0_50, %c0_51] : memref<57x57xbf16, #tpu.memory_space<vmem>>, vector<57x57xbf16>
    %111 = arith.truncf %109 : vector<57x32xf32> to vector<57x32xbf16>
    %cst_52 = arith.constant dense<0.000000e+00> : vector<57x32xf32>
    %112 = tpu.matmul %110, %111, %cst_52 {dimension_numbers = #tpu.dot_dimension_numbers<[1], [0], [0], [1], [0, 0, 1, 1], [], []>} : vector<57x57xbf16>, vector<57x32xbf16>, vector<57x32xf32> -> vector<57x32xf32>
    %113 = vector.broadcast %4 : vector<1x32xf32> to vector<57x32xf32>
    %114 = arith.addf %112, %113 : vector<57x32xf32>
    %cst_53 = arith.constant dense<0.000000e+00> : vector<57xf32>
    %115 = vector.multi_reduction <add>, %114, %cst_53 [1] : vector<57x32xf32> to vector<57xf32>
    %116 = vector.shape_cast %115 : vector<57xf32> to vector<57x1xf32>
    %cst_54 = arith.constant 3.200000e+01 : f32
    %117 = vector.broadcast %cst_54 : f32 to vector<57x1xf32>
    %118 = arith.divf %116, %117 : vector<57x1xf32>
    %119 = vector.broadcast %118 : vector<57x1xf32> to vector<57x32xf32>
    %120 = arith.subf %114, %119 : vector<57x32xf32>
    %121 = arith.mulf %120, %120 : vector<57x32xf32>
    %cst_55 = arith.constant dense<0.000000e+00> : vector<57xf32>
    %122 = vector.multi_reduction <add>, %121, %cst_55 [1] : vector<57x32xf32> to vector<57xf32>
    %123 = vector.shape_cast %122 : vector<57xf32> to vector<57x1xf32>
    %cst_56 = arith.constant 3.200000e+01 : f32
    %124 = vector.broadcast %cst_56 : f32 to vector<57x1xf32>
    %125 = arith.divf %123, %124 : vector<57x1xf32>
    %cst_57 = arith.constant 9.99999974E-6 : f32
    %126 = vector.broadcast %cst_57 : f32 to vector<57x1xf32>
    %127 = arith.addf %125, %126 : vector<57x1xf32>
    %128 = math.rsqrt %127 : vector<57x1xf32>
    %129 = vector.broadcast %128 : vector<57x1xf32> to vector<57x32xf32>
    %130 = arith.mulf %120, %129 : vector<57x32xf32>
    %131 = vector.broadcast %5 : vector<1x32xf32> to vector<57x32xf32>
    %132 = arith.mulf %130, %131 : vector<57x32xf32>
    %133 = vector.broadcast %6 : vector<1x32xf32> to vector<57x32xf32>
    %134 = arith.addf %132, %133 : vector<57x32xf32>
    %cst_58 = arith.constant 0.000000e+00 : f32
    %135 = vector.broadcast %cst_58 : f32 to vector<57x32xf32>
    %136 = arith.maximumf %134, %135 : vector<57x32xf32>
    %c1_59 = arith.constant 1 : index
    %c0_60 = arith.constant 0 : index
    %c0_61 = arith.constant 0 : index
    %137 = vector.load %arg1[%c1_59, %c0_60, %c0_61] : memref<2x57x32xf32, #tpu.memory_space<vmem>>, vector<1x57x32xf32>
    %138 = vector.shape_cast %137 : vector<1x57x32xf32> to vector<57x32xf32>
    %139 = arith.addf %136, %138 : vector<57x32xf32>
    %c1_62 = arith.constant 1 : index
    %c0_63 = arith.constant 0 : index
    %c0_64 = arith.constant 0 : index
    %140 = vector.load %arg7[%c1_62, %c0_63, %c0_64] : memref<2x57x32xf32, #tpu.memory_space<vmem>>, vector<1x57x32xf32>
    %141 = vector.shape_cast %140 : vector<1x57x32xf32> to vector<57x32xf32>
    %142 = vector.shape_cast %139 : vector<57x32xf32> to vector<1x57x32xf32>
    tpu.vector_store %arg7[%c1_62, %c0_63, %c0_64], %142 {strides = array<i32>} : memref<2x57x32xf32, #tpu.memory_space<vmem>>, vector<1x57x32xf32>,
    return
  }
  func.func @transform_0(%arg0: i32) -> (i32, i32, i32) {
    %c0_i32 = arith.constant 0 : i32
    %c0_i32_0 = arith.constant 0 : i32
    %c0_i32_1 = arith.constant 0 : i32
    return %arg0, %c0_i32, %c0_i32_0 : i32, i32, i32
  }
  func.func @transform_1(%arg0: i32) -> (i32, i32) {
    %c0_i32 = arith.constant 0 : i32
    %c0_i32_0 = arith.constant 0 : i32
    %c0_i32_1 = arith.constant 0 : i32
    return %c0_i32, %c0_i32_0 : i32, i32
  }
  func.func @transform_2(%arg0: i32) -> (i32, i32) {
    %c0_i32 = arith.constant 0 : i32
    %c0_i32_0 = arith.constant 0 : i32
    %c0_i32_1 = arith.constant 0 : i32
    return %c0_i32, %c0_i32_0 : i32, i32
  }
  func.func @transform_3(%arg0: i32) -> (i32, i32) {
    %c0_i32 = arith.constant 0 : i32
    %c0_i32_0 = arith.constant 0 : i32
    %c0_i32_1 = arith.constant 0 : i32
    return %c0_i32, %c0_i32_0 : i32, i32
  }
  func.func @transform_4(%arg0: i32) -> (i32, i32) {
    %c0_i32 = arith.constant 0 : i32
    %c0_i32_0 = arith.constant 0 : i32
    %c0_i32_1 = arith.constant 0 : i32
    return %c0_i32, %c0_i32_0 : i32, i32
  }
  func.func @transform_5(%arg0: i32) -> (i32, i32) {
    %c0_i32 = arith.constant 0 : i32
    %c0_i32_0 = arith.constant 0 : i32
    %c0_i32_1 = arith.constant 0 : i32
    return %c0_i32, %c0_i32_0 : i32, i32
  }
  func.func @transform_6(%arg0: i32) -> (i32, i32, i32) {
    %c0_i32 = arith.constant 0 : i32
    %c0_i32_0 = arith.constant 0 : i32
    %c0_i32_1 = arith.constant 0 : i32
    return %arg0, %c0_i32, %c0_i32_0 : i32, i32, i32
  }
}

</mosaic_0001>

<bundles_post_ra>
// kernel: gc_blockv2.1
= control target key start
LH: loop header
LB: loop body
LE: loop exit
PB: predicated region body
PF: predicated region fallthrough
CT: control target
= control target key end

     0   :  { %vm53_vm0 = vcmask 261120   ;;  %vm167_vm1 = vcmask 465920   ;;  %vm180_vm2 = vcmask 1043456   ;;  %vm181_vm3 = vcmask 1044480   ;;  %s2555_s2 = inlined_call_operand.vmem [shape: bf16[32,32], index: 2, kind: input, shape index: {}]   ;;  %s2556_s0 = inlined_call_operand.vmem [shape: f32[2,57,32], index: 0, kind: input, shape index: {}]   ;;  %s2557_s1 = inlined_call_operand.vmem [shape: bf16[57,57], index: 1, kind: input, shape index: {}]   ;;  %s2558_s5 = inlined_call_operand.vmem [shape: f32[6,32], index: 5, kind: input, shape index: {}]   ;;  %s2559_s4 = inlined_call_operand.vmem [shape: bf16[32,32], index: 4, kind: input, shape index: {}]   ;;  %s2560_s3 = inlined_call_operand.vmem [shape: bf16[57,57], index: 3, kind: input, shape index: {}]   ;;  %s2561_s6 = inlined_call_operand.vmem [shape: f32[2,57,32], index: 6, kind: output, shape index: {}]  }
   0x1   :  { %v1700_v0 = vld [vmem:[%s2555_s2] sm:$0xff]   ;;  %v1701_v1 = vld [vmem:[%s2555_s2 + $0x8] sm:$0xff]   ;;  %v27_v5 = vld [vmem:[%s2556_s0 + $0x10] sm:$0xff]  ;;  %v1805_v21 = vmov 65535   ;;  %v143_v34 = vlaneseq  ;;  %vm273_vm4 = vcmask 253952  }
   0x2   :  { %1587 = vmatprep.subr.bf16.mxu0 %v1700_v0  ;;  %v25_v2 = vld [vmem:[%s2556_s0] sm:$0xff]  ;;  %v26_v3 = vld [vmem:[%s2556_s0 + $0x8] sm:$0xff]  ;;  %v28_v6 = vld [vmem:[%s2556_s0 + $0x18] sm:$0xff]  ;;  %v182_v22 = vsel %vm180_vm2, 4294967295, %v1805_v21 }
   0x3   :  { %1588 = vmatpush3.bf16.msra.mxu0 %v1700_v0  ;;  %v33_v4 = vpack.c.bf16 %v26_v3, %v25_v2  ;;  %v29_v7 = vld [vmem:[%s2556_s0 + $0x20] sm:$0xff]  ;;  %v30_v8 = vld [vmem:[%s2556_s0 + $0x28] sm:$0xff]  ;;  %v34_v9 = vpack.c.bf16 %v28_v6, %v27_v5  ;;  %v31_v11 = vld [vmem:[%s2556_s0 + $0x30] sm:$0xff]  ;;  %v1879_v26 = vsel %vm181_vm3, %v182_v22, 0  ;;  %v1894_v35 = vshrl.u32 %v143_v34, 7 }
   0x4   :  { %1589 = vmatprep.subr.bf16.mxu0 %v1701_v1  ;;  %v35_v10 = vpack.c.bf16 %v30_v8, %v29_v7  ;;  %v32_v12 = vld [vmem:[%s2556_s0 + $0x38] sm:$0x1]  ;;  %v1702_v14 = vld [vmem:[%s2557_s1] sm:$0xff]   ;;  %v1703_v31 = vld [vmem:[%s2557_s1 + $0x8] sm:$0xff]  }
   0x5   :  { %1591 = vmatprep.mubr.msk.bf16.mxu0 %vm53_vm0, %v33_v4  ;;  %v36_v13 = vpack.c.bf16 %v32_v12, %v31_v11  ;;  %1607 = vmatprep.mubr.msk.bf16.mxu1 %vm167_vm1, %v1702_v14  ;;  %v1704_v32 = vld [vmem:[%s2557_s1 + $0x10] sm:$0xff]   ;;  %v1705_v33 = vld [vmem:[%s2557_s1 + $0x18] sm:$0x1f]   ;;  %v145_v36 = vsub.s32 0, %v1894_v35  ;;  %v1900_v37 = vld [vmem:[%s2558_s5] sm:$0x3f] }
   0x7   :  { %1590 = vmatpush3.bf16.msra.mxu0 %v1701_v1  ;;  %v1903_v38 = vrot.slane %v1900_v37, %v145_v36 }
   0xa   :  { %1592 = vmatmul.mubr.msk.bf16.vlgmr.msra.gmra.mrb[0].mxu0 %vm53_vm0, %v34_v9 }
   0xb   :  { %1595 = vmatprep.mubr.msk.bf16.mxu0 %vm53_vm0, %v35_v10 }
  0x12   :  { %1596 = vmatmul.mubr.msk.bf16.gmra.mrb[4].mxu0 %vm53_vm0, %v36_v13 }
  0xdd   :  { %v1593_v15 = vpop.f32.mrb[0].mxu0 }
  0xde   :  { %v100_v16 = vpop.f32.mrb[1].mxu0 }
  0xdf   :  { %v1594_v17 = vpop.f32.mrb[2].mxu0 }
  0xe0   :  { %v140_v18 = vpack.c.bf16 %v1594_v17, %v1593_v15  ;;  %v103_v19 = vpop.f32.mrb[3].mxu0 }
  0xe1   :  { %v139_v20 = vpack.c.bf16 %v103_v19, %v100_v16 }
  0xe3   :  { %1599 = vmatprep.subr.bf16.mxu1 %v139_v20 }
  0xe4   :  { %1600 = vmatpush3.bf16.msra.mxu1 %v139_v20 }
  0xe5   :  { %v1597_v23 = vpop.f32.mrb[4].mxu0  ;;  %1601 = vmatprep.subr.bf16.mxu1 %v140_v18 }
  0xe6   :  { %v116_v24 = vpop.f32.mrb[5].mxu0 }
  0xe7   :  { %v1598_v25 = vpop.f32.mrb[6].mxu0 }
  0xe8   :  { %v142_v27 = vpack.c.bf16 %v1598_v25, %v1597_v23  ;;  %v119_v28 = vpop.f32.mrb[7].mxu0  ;;  %1602 = vmatpush3.bf16.msra.mxu1 %v140_v18 }
  0xe9   :  { %v141_v29 = vpack.c.bf16 %v119_v28, %v116_v24 }
  0xea   :  { %v185_v30 = vand.u32 %v1879_v26, %v142_v27 }
  0xeb   :  { %1603 = vmatprep.subr.bf16.mxu1 %v141_v29 }
  0xec   :  { %1604 = vmatpush3.bf16.msra.mxu1 %v141_v29 }
  0xed   :  { %1605 = vmatprep.subr.bf16.mxu1 %v185_v30 }
  0xf0   :  { %1606 = vmatpush3.bf16.msra.mxu1 %v185_v30 }
  0xf3   :  { %1608 = vmatmul.mubr.msk.bf16.vlgmr.msra.gmra.mrb[0].mxu1 %vm167_vm1, %v1703_v31 }
  0xf4   :  { %1611 = vmatprep.mubr.msk.bf16.mxu1 %vm167_vm1, %v1704_v32 }
  0xfb   :  { %1612 = vmatmul.mubr.msk.bf16.gmra.mrb[4].mxu1 %vm167_vm1, %v1705_v33 }
 0x1c6   :  { %v1609_v39 = vpop.f32.mrb[0].mxu1 }
 0x1c7   :  { %v230_v40 = vadd.f32 %v1609_v39, %v1903_v38  ;;  %v221_v41 = vpop.f32.mrb[1].mxu1 }
 0x1c8   :  { %v222_v42 = vadd.f32 %v221_v41, %v1903_v38  ;;  %v1610_v43 = vpop.f32.mrb[2].mxu1 }
 0x1c9   :  { %v233_v44 = vadd.f32 %v1610_v43, %v1903_v38  ;;  %v224_v45 = vpop.f32.mrb[3].mxu1  ;;  %v258_v46 = vsel %vm53_vm0, %v230_v40, 0.0  ;;  %v1706_v43 = vld [vmem:[%s2559_s4] sm:$0xff]  }
 0x1ca   :  { %v225_v47 = vadd.f32 %v224_v45, %v1903_v38  ;;  %259 = vadd.xlane.f32.xlu1 %v258_v46  ;;  %v252_v48 = vsel %vm53_vm0, %v222_v42, 0.0  ;;  %1615 = vmatprep.subr.bf16.mxu0 %v1706_v43  ;;  %v1970_v45 = vld [vmem:[%s2555_s2] sm:$0xff]  }
 0x1cb   :  { %253 = vadd.xlane.f32.xlu0 %v252_v48  ;;  %v261_v49 = vsel %vm53_vm0, %v233_v44, 0.0  ;;  %1616 = vmatpush3.bf16.msra.mxu0 %v1706_v43 }
 0x1cc   :  { %v255_v51 = vsel %vm53_vm0, %v225_v47, 0.0 }
 0x1ce   :  { %262 = vadd.xlane.f32.xlu1 %v261_v49  ;;  %v1613_v50 = vpop.f32.mrb[4].mxu1 }
 0x1cf   :  { %v237_v52 = vpop.f32.mrb[5].mxu1  ;;  %256 = vadd.xlane.f32.xlu0 %v255_v51  ;;  %v246_v56 = vadd.f32 %v1613_v50, %v1903_v38 }
 0x1d0   :  { %v238_v53 = vadd.f32 %v237_v52, %v1903_v38  ;;  %v1614_v54 = vpop.f32.mrb[6].mxu1 }
 0x1d1   :  { %v240_v55 = vpop.f32.mrb[7].mxu1  ;;  %v249_v59 = vadd.f32 %v1614_v54, %v1903_v38  ;;  %v270_v61 = vsel %vm53_vm0, %v246_v56, 0.0 }
 0x1d2   :  { %v241_v57 = vadd.f32 %v240_v55, %v1903_v38  ;;  %v264_v58 = vsel %vm53_vm0, %v238_v53, 0.0 }
 0x1d3   :  { %265 = vadd.xlane.f32.xlu0 %v264_v58  ;;  %v274_v62 = vsel %vm273_vm4, %v249_v59, 0.0 }
 0x1d4   :  { %v267_v60 = vsel %vm53_vm0, %v241_v57, 0.0 }
 0x1d5   :  { %268 = vadd.xlane.f32.xlu1 %v267_v60 }
 0x1d7   :  { %271 = vadd.xlane.f32.xlu0 %v270_v61 }
 0x1d9   :  { %275 = vadd.xlane.f32.xlu1 %v274_v62 }
 0x257   :  { %v260_v63 = vpop.xlane.xlu1 %259 }
 0x258   :  { %v280_v0 = vmul.f32 0.03125, %v260_v63  ;;  %v254_v1 = vpop.xlane.xlu0 %253 }
 0x259   :  { %v278_v2 = vmul.f32 0.03125, %v254_v1 }
 0x25a   :  { %v1921_v3 = vsub.f32 %v230_v40, %v280_v0 }
 0x25b   :  { %v1923_v4 = vsub.f32 %v222_v42, %v278_v2  ;;  %v263_v5 = vpop.xlane.xlu1 %262 }
 0x25c   :  { %v281_v6 = vmul.f32 0.03125, %v263_v5  ;;  %v257_v7 = vpop.xlane.xlu0 %256  ;;  %v296_v13 = vmul.f32 %v1921_v3, %v1921_v3  ;;  %v372_v5 = vsub.s32 2, %v1894_v35 }
 0x25d   :  { %v279_v8 = vmul.f32 0.03125, %v257_v7  ;;  %v294_v9 = vmul.f32 %v1923_v4, %v1923_v4 }
 0x25e   :  { %v1927_v10 = vsub.f32 %v233_v44, %v281_v6  ;;  %v308_v21 = vsel %vm53_vm0, %v296_v13, 0.0  ;;  %v1707_v44 = vld [vmem:[%s2559_s4 + $0x8] sm:$0xff]  }
 0x25f   :  { %v1929_v11 = vsub.f32 %v225_v47, %v279_v8  ;;  %v302_v12 = vsel %vm53_vm0, %v294_v9, 0.0  ;;  %1617 = vmatprep.subr.bf16.mxu0 %v1707_v44 }
 0x260   :  { %303 = vadd.xlane.f32.xlu0 %v302_v12  ;;  %v266_v14 = vpop.xlane.xlu0 %265  ;;  %v297_v18 = vmul.f32 %v1927_v10, %v1927_v10  ;;  %1618 = vmatpush3.bf16.msra.mxu0 %v1707_v44 }
 0x261   :  { %v282_v15 = vmul.f32 0.03125, %v266_v14  ;;  %v295_v16 = vmul.f32 %v1929_v11, %v1929_v11  ;;  %1643 = vmatprep.subr.bf16.mxu0 %v1970_v45  ;;  %v1980_v14 = vrot.slane %v1900_v37, %v372_v5 }
 0x262   :  { %v269_v17 = vpop.xlane.xlu1 %268  ;;  %v311_v29 = vsel %vm53_vm0, %v297_v18, 0.0 }
 0x263   :  { %v1938_v19 = vsub.f32 %v238_v53, %v282_v15  ;;  %v283_v20 = vmul.f32 0.03125, %v269_v17  ;;  %v305_v22 = vsel %vm53_vm0, %v295_v16, 0.0 }
 0x264   :  { %309 = vadd.xlane.f32.xlu0 %v308_v21  ;;  %306 = vadd.xlane.f32.xlu1 %v305_v22  ;;  %v272_v23 = vpop.xlane.xlu0 %271 }
 0x265   :  { %v1942_v24 = vsub.f32 %v241_v57, %v283_v20  ;;  %v284_v25 = vmul.f32 0.03125, %v272_v23  ;;  %v298_v27 = vmul.f32 %v1938_v19, %v1938_v19 }
 0x266   :  { %v276_v28 = vpop.xlane.xlu1 %275 }
 0x267   :  { %v1947_v30 = vsub.f32 %v246_v56, %v284_v25  ;;  %v285_v31 = vmul.f32 0.03125, %v276_v28  ;;  %v314_v32 = vsel %vm53_vm0, %v298_v27, 0.0  ;;  %v299_v33 = vmul.f32 %v1942_v24, %v1942_v24 }
 0x268   :  { %312 = vadd.xlane.f32.xlu1 %v311_v29  ;;  %315 = vadd.xlane.f32.xlu0 %v314_v32 }
 0x269   :  { %v1952_v34 = vsub.f32 %v249_v59, %v285_v31  ;;  %v300_v36 = vmul.f32 %v1947_v30, %v1947_v30  ;;  %v317_v39 = vsel %vm53_vm0, %v299_v33, 0.0  ;;  %v360_v59 = vsub.s32 1, %v1894_v35 }
 0x26b   :  { %v320_v40 = vsel %vm53_vm0, %v300_v36, 0.0  ;;  %v301_v41 = vmul.f32 %v1952_v34, %v1952_v34  ;;  %v1975_v2 = vrot.slane %v1900_v37, %v360_v59 }
 0x26c   :  { %318 = vadd.xlane.f32.xlu1 %v317_v39  ;;  %321 = vadd.xlane.f32.xlu0 %v320_v40 }
 0x26d   :  { %v323_v42 = vsel %vm273_vm4, %v301_v41, 0.0 }
 0x270   :  { %324 = vadd.xlane.f32.xlu1 %v323_v42 }
 0x2ed   :  { %v304_v46 = vpop.xlane.xlu0 %303 }
 0x2ee   :  { %v326_v47 = vmul.f32 0.03125, %v304_v46 }
 0x2f0   :  { %v334_v48 = vadd.f32 1e-05, %v326_v47 }
 0x2f1   :  { %v307_v49 = vpop.xlane.xlu1 %306  ;;  %v310_v50 = vpop.xlane.xlu0 %309 }
 0x2f2   :  { %1724 = vrsqrt.f32 %v334_v48  ;;  %v327_v51 = vmul.f32 0.03125, %v307_v49  ;;  %v328_v52 = vmul.f32 0.03125, %v310_v50 }
 0x2f4   :  { %v335_v53 = vadd.f32 1e-05, %v327_v51  ;;  %v336_v54 = vadd.f32 1e-05, %v328_v52 }
 0x2f5   :  { %v313_v55 = vpop.xlane.xlu1 %312  ;;  %v316_v56 = vpop.xlane.xlu0 %315 }
 0x2f6   :  { %1726 = vrsqrt.f32 %v335_v53  ;;  %v329_v57 = vmul.f32 0.03125, %v313_v55  ;;  %v330_v58 = vmul.f32 0.03125, %v316_v56 }
 0x2f7   :  { %1728 = vrsqrt.f32 %v336_v54 }
 0x2f8   :  { %v337_v60 = vadd.f32 1e-05, %v329_v57  ;;  %v338_v61 = vadd.f32 1e-05, %v330_v58  ;;  %v1487_v57 = vld [vmem:[%s2556_s0 + $0x40] sm:$0xff]  ;;  %v1488_v58 = vld [vmem:[%s2556_s0 + $0x48] sm:$0xff] }
 0x2f9   :  { %v319_v62 = vpop.xlane.xlu1 %318  ;;  %v322_v63 = vpop.xlane.xlu0 %321 }
 0x2fa   :  { %1730 = vrsqrt.f32 %v337_v60  ;;  %v331_v0 = vmul.f32 0.03125, %v319_v62  ;;  %v332_v1 = vmul.f32 0.03125, %v322_v63  ;;  %v1490_v63 = vld [vmem:[%s2556_s0 + $0x58] sm:$0xff] }
 0x2fb   :  { %1732 = vrsqrt.f32 %v338_v61  ;;  %v764_v61 = vpack.c.bf16 %v1488_v58, %v1487_v57 }
 0x2fc   :  { %v1725_v6 = vpop.eup %1724  ;;  %v339_v7 = vadd.f32 1e-05, %v331_v0  ;;  %v340_v8 = vadd.f32 1e-05, %v332_v1  ;;  %v1491_v0 = vld [vmem:[%s2556_s0 + $0x60] sm:$0xff]  ;;  %v1492_v1 = vld [vmem:[%s2556_s0 + $0x68] sm:$0xff] }
 0x2fd   :  { %v350_v9 = vmul.f32 %v1725_v6, %v1923_v4  ;;  %v325_v12 = vpop.xlane.xlu1 %324  ;;  %v766_v6 = vpack.c.bf16 %v1492_v1, %v1491_v0 }
 0x2fe   :  { %1734 = vrsqrt.f32 %v339_v7  ;;  %v333_v13 = vmul.f32 0.03125, %v325_v12  ;;  %v1493_v7 = vld [vmem:[%s2556_s0 + $0x70] sm:$0xff]  ;;  %v1710_v12 = vld [vmem:[%s2560_s3] sm:$0xff]  }
 0x2ff   :  { %1736 = vrsqrt.f32 %v340_v8  ;;  %v362_v15 = vmul.f32 %v1975_v2, %v350_v9  ;;  %v1494_v8 = vld [vmem:[%s2556_s0 + $0x78] sm:$0x1]  ;;  %1635 = vmatprep.mubr.msk.bf16.mxu1 %vm167_vm1, %v1710_v12 }
 0x300   :  { %v1727_v16 = vpop.eup %1726  ;;  %v341_v17 = vadd.f32 1e-05, %v333_v13  ;;  %v767_v9 = vpack.c.bf16 %v1494_v8, %v1493_v7 }
 0x301   :  { %v1729_v18 = vpop.eup %1728  ;;  %v351_v20 = vmul.f32 %v1727_v16, %v1929_v11  ;;  %v374_v4 = vadd.f32 %v1980_v14, %v362_v15 }
 0x302   :  { %v352_v21 = vmul.f32 %v1729_v18, %v1921_v3  ;;  %1738 = vrsqrt.f32 %v341_v17 }
 0x303   :  { %v363_v22 = vmul.f32 %v1975_v2, %v351_v20  ;;  %v382_v3 = vmax.f32 %v374_v4, 0.0 }
 0x304   :  { %v1731_v23 = vpop.eup %1730  ;;  %v364_v25 = vmul.f32 %v1975_v2, %v352_v21 }
 0x305   :  { %v1733_v27 = vpop.eup %1732  ;;  %v353_v28 = vmul.f32 %v1731_v23, %v1927_v10  ;;  %v375_v29 = vadd.f32 %v1980_v14, %v363_v22 }
 0x306   :  { %v354_v31 = vmul.f32 %v1733_v27, %v1938_v19  ;;  %v376_v32 = vadd.f32 %v1980_v14, %v364_v25 }
 0x307   :  { %v365_v11 = vmul.f32 %v1975_v2, %v353_v28  ;;  %v383_v33 = vmax.f32 %v375_v29, 0.0 }
 0x308   :  { %v1735_v36 = vpop.eup %1734  ;;  %v366_v39 = vmul.f32 %v1975_v2, %v354_v31  ;;  %v384_v44 = vmax.f32 %v376_v32, 0.0 }
 0x309   :  { %v1737_v40 = vpop.eup %1736  ;;  %v377_v41 = vadd.f32 %v1980_v14, %v365_v11  ;;  %v355_v42 = vmul.f32 %v1735_v36, %v1942_v24  ;;  %v390_v43 = vpack.c.bf16 %v383_v33, %v382_v3  ;;  %v1709_v24 = vld [vmem:[%s2555_s2 + $0x8] sm:$0xff]   ;;  %v1712_v36 = vld [vmem:[%s2560_s3 + $0x10] sm:$0xff]  }
 0x30a   :  { %v356_v10 = vmul.f32 %v1737_v40, %v1947_v30  ;;  %v378_v47 = vadd.f32 %v1980_v14, %v366_v39  ;;  %v1711_v11 = vld [vmem:[%s2560_s3 + $0x8] sm:$0xff]  }
 0x30b   :  { %v385_v46 = vmax.f32 %v377_v41, 0.0  ;;  %1619 = vmatprep.mubr.msk.bf16.mxu0 %vm53_vm0, %v390_v43  ;;  %v367_v19 = vmul.f32 %v1975_v2, %v355_v42  ;;  %v1713_v43 = vld [vmem:[%s2560_s3 + $0x18] sm:$0x1f]  }
 0x30c   :  { %v1739_v48 = vpop.eup %1738  ;;  %v368_v49 = vmul.f32 %v1975_v2, %v356_v10  ;;  %v386_v30 = vmax.f32 %v378_v47, 0.0 }
 0x30d   :  { %v357_v50 = vmul.f32 %v1739_v48, %v1952_v34  ;;  %v391_v51 = vpack.c.bf16 %v385_v46, %v384_v44  ;;  %v379_v52 = vadd.f32 %v1980_v14, %v367_v19  ;;  %v1714_v46 = vld [vmem:[%s2557_s1] sm:$0xff]   ;;  %v1715_v48 = vld [vmem:[%s2557_s1 + $0x8] sm:$0xff]  }
 0x30e   :  { %v380_v55 = vadd.f32 %v1980_v14, %v368_v49  ;;  %v1716_v49 = vld [vmem:[%s2557_s1 + $0x10] sm:$0xff]  }
 0x30f   :  { %1620 = vmatmul.mubr.msk.bf16.vlgmr.msra.gmra.mrb[8].mxu0 %vm53_vm0, %v391_v51  ;;  %v387_v53 = vmax.f32 %v379_v52, 0.0  ;;  %v369_v54 = vmul.f32 %v1975_v2, %v357_v50  ;;  %v1717_v50 = vld [vmem:[%s2557_s1 + $0x18] sm:$0x1f]  }
 0x310   :  { %1644 = vmatpush3.bf16.msra.mxu0 %v1970_v45  ;;  %v388_v59 = vmax.f32 %v380_v55, 0.0  ;;  %v1489_v45 = vld [vmem:[%s2556_s0 + $0x50] sm:$0xff] }
 0x311   :  { %v392_v56 = vpack.c.bf16 %v387_v53, %v386_v30  ;;  %v381_v34 = vadd.f32 %v1980_v14, %v369_v54  ;;  %1645 = vmatprep.subr.bf16.mxu0 %v1709_v24  ;;  %v765_v5 = vpack.c.bf16 %v1490_v63, %v1489_v45 }
 0x313   :  { %1623 = vmatprep.mubr.msk.bf16.mxu0 %vm53_vm0, %v392_v56  ;;  %v389_v60 = vmax.f32 %v381_v34, 0.0 }
 0x314   :  { %1646 = vmatpush3.bf16.msra.mxu0 %v1709_v24 }
 0x315   :  { %v393_v62 = vpack.c.bf16 %v389_v60, %v388_v59 }
 0x317   :  { %1624 = vmatmul.mubr.msk.bf16.gmra.mrb[12].mxu0 %vm53_vm0, %v393_v62 }
 0x318   :  { %1647 = vmatprep.mubr.msk.bf16.mxu0 %vm53_vm0, %v764_v61 }
 0x31f   :  { %1648 = vmatmul.mubr.msk.bf16.vlgmr.msra.gmra.mrb[16].mxu0 %vm53_vm0, %v765_v5 }
 0x320   :  { %1651 = vmatprep.mubr.msk.bf16.mxu0 %vm53_vm0, %v766_v6 }
 0x327   :  { %1652 = vmatmul.mubr.msk.bf16.gmra.mrb[20].mxu0 %vm53_vm0, %v767_v9 }
 0x3e2   :  { %v1621_v13 = vpop.f32.mrb[8].mxu0 }
 0x3e3   :  { %v456_v15 = vpop.f32.mrb[9].mxu0 }
 0x3e4   :  { %v1622_v16 = vpop.f32.mrb[10].mxu0 }
 0x3e5   :  { %v496_v17 = vpack.c.bf16 %v1622_v16, %v1621_v13  ;;  %v459_v18 = vpop.f32.mrb[11].mxu0 }
 0x3e6   :  { %v495_v20 = vpack.c.bf16 %v459_v18, %v456_v15 }
 0x3e8   :  { %1627 = vmatprep.subr.bf16.mxu1 %v495_v20 }
 0x3e9   :  { %1628 = vmatpush3.bf16.msra.mxu1 %v495_v20 }
 0x3ea   :  { %v1625_v21 = vpop.f32.mrb[12].mxu0  ;;  %1629 = vmatprep.subr.bf16.mxu1 %v496_v17 }
 0x3eb   :  { %v472_v22 = vpop.f32.mrb[13].mxu0 }
 0x3ec   :  { %v1626_v4 = vpop.f32.mrb[14].mxu0 }
 0x3ed   :  { %v498_v23 = vpack.c.bf16 %v1626_v4, %v1625_v21  ;;  %v475_v25 = vpop.f32.mrb[15].mxu0  ;;  %1630 = vmatpush3.bf16.msra.mxu1 %v496_v17 }
 0x3ee   :  { %v497_v27 = vpack.c.bf16 %v475_v25, %v472_v22 }
 0x3ef   :  { %v536_v28 = vand.u32 %v498_v23, %v1879_v26 }
 0x3f0   :  { %1631 = vmatprep.subr.bf16.mxu1 %v497_v27 }
 0x3f1   :  { %1632 = vmatpush3.bf16.msra.mxu1 %v497_v27 }
 0x3f2   :  { %1633 = vmatprep.subr.bf16.mxu1 %v536_v28  ;;  %v1649_v29 = vpop.f32.mrb[16].mxu0 }
 0x3f3   :  { %v830_v31 = vpop.f32.mrb[17].mxu0 }
 0x3f4   :  { %v1650_v32 = vpop.f32.mrb[18].mxu0 }
 0x3f5   :  { %v870_v3 = vpack.c.bf16 %v1650_v32, %v1649_v29  ;;  %1634 = vmatpush3.bf16.msra.mxu1 %v536_v28  ;;  %v833_v33 = vpop.f32.mrb[19].mxu0 }
 0x3f6   :  { %v869_v39 = vpack.c.bf16 %v833_v33, %v830_v31 }
 0x3f8   :  { %1636 = vmatmul.mubr.msk.bf16.vlgmr.msra.gmra.mrb[8].mxu1 %vm167_vm1, %v1711_v11  ;;  %1655 = vmatprep.subr.bf16.mxu1 %v869_v39 }
 0x3f9   :  { %1656 = vmatpush3.bf16.msra.mxu1 %v869_v39  ;;  %1639 = vmatprep.mubr.msk.bf16.mxu1 %vm167_vm1, %v1712_v36 }
 0x3fa   :  { %v1653_v40 = vpop.f32.mrb[20].mxu0  ;;  %1657 = vmatprep.subr.bf16.mxu1 %v870_v3 }
 0x3fb   :  { %v846_v41 = vpop.f32.mrb[21].mxu0 }
 0x3fc   :  { %v1654_v42 = vpop.f32.mrb[22].mxu0 }
 0x3fd   :  { %v872_v10 = vpack.c.bf16 %v1654_v42, %v1653_v40  ;;  %v849_v44 = vpop.f32.mrb[23].mxu0  ;;  %1658 = vmatpush3.bf16.msra.mxu1 %v870_v3 }
 0x3fe   :  { %v871_v19 = vpack.c.bf16 %v849_v44, %v846_v41 }
 0x3ff   :  { %v906_v47 = vand.u32 %v872_v10, %v1879_v26  ;;  %v501_v10 = vsub.s32 3, %v1894_v35 }
 0x400   :  { %1640 = vmatmul.mubr.msk.bf16.gmra.mrb[12].mxu1 %vm167_vm1, %v1713_v43  ;;  %1659 = vmatprep.subr.bf16.mxu1 %v871_v19 }
 0x401   :  { %1660 = vmatpush3.bf16.msra.mxu1 %v871_v19  ;;  %1663 = vmatprep.mubr.msk.bf16.mxu1 %vm167_vm1, %v1714_v46 }
 0x402   :  { %1661 = vmatprep.subr.bf16.mxu1 %v906_v47 }
 0x405   :  { %1662 = vmatpush3.bf16.msra.mxu1 %v906_v47 }
 0x408   :  { %1664 = vmatmul.mubr.msk.bf16.vlgmr.msra.gmra.mrb[16].mxu1 %vm167_vm1, %v1715_v48 }
 0x409   :  { %1667 = vmatprep.mubr.msk.bf16.mxu1 %vm167_vm1, %v1716_v49 }
 0x410   :  { %1668 = vmatmul.mubr.msk.bf16.gmra.mrb[20].mxu1 %vm167_vm1, %v1717_v50 }
 0x4cb   :  { %v2075_v51 = vpop.f32.mrb[8].mxu1 }
 0x4cc   :  { %v2077_v52 = vpop.f32.mrb[9].mxu1 }
 0x4cd   :  { %v2079_v24 = vpop.f32.mrb[10].mxu1 }
 0x4ce   :  { %v2081_v30 = vpop.f32.mrb[11].mxu1 }
 0x4d3   :  { %v2083_v53 = vpop.f32.mrb[12].mxu1 }
 0x4d4   :  { %v2085_v54 = vpop.f32.mrb[13].mxu1 }
 0x4d5   :  { %v2087_v55 = vpop.f32.mrb[14].mxu1 }
 0x4d6   :  { %v2089_v56 = vpop.f32.mrb[15].mxu1 }
 0x4db   :  { %v1665_v34 = vpop.f32.mrb[16].mxu1 }
 0x4dc   :  { %v942_v57 = vpop.f32.mrb[17].mxu1  ;;  %v951_v61 = vadd.f32 %v1665_v34, %v1903_v38 }
 0x4dd   :  { %v943_v58 = vadd.f32 %v942_v57, %v1903_v38  ;;  %v1666_v59 = vpop.f32.mrb[18].mxu1 }
 0x4de   :  { %v945_v60 = vpop.f32.mrb[19].mxu1  ;;  %v954_v63 = vadd.f32 %v1666_v59, %v1903_v38  ;;  %v979_v5 = vsel %vm53_vm0, %v951_v61, 0.0  ;;  %v2135_v59 = vrot.slane %v1900_v37, %v501_v10 }
 0x4df   :  { %v946_v62 = vadd.f32 %v945_v60, %v1903_v38  ;;  %v973_v45 = vsel %vm53_vm0, %v943_v58, 0.0 }
 0x4e0   :  { %974 = vadd.xlane.f32.xlu0 %v973_v45  ;;  %v982_v9 = vsel %vm53_vm0, %v954_v63, 0.0  ;;  %v2149_v37 = vadd.f32 %v2077_v52, %v2135_v59 }
 0x4e1   :  { %v976_v0 = vsel %vm53_vm0, %v946_v62, 0.0 }
 0x4e2   :  { %977 = vadd.xlane.f32.xlu1 %v976_v0  ;;  %v603_v52 = vsel %vm53_vm0, %v2149_v37, 0.0 }
 0x4e3   :  { %v1669_v1 = vpop.f32.mrb[20].mxu1 }
 0x4e4   :  { %v958_v6 = vpop.f32.mrb[21].mxu1  ;;  %980 = vadd.xlane.f32.xlu0 %v979_v5  ;;  %v967_v13 = vadd.f32 %v1669_v1, %v1903_v38 }
 0x4e5   :  { %v959_v7 = vadd.f32 %v958_v6, %v1903_v38  ;;  %v1670_v8 = vpop.f32.mrb[22].mxu1 }
 0x4e6   :  { %v961_v12 = vpop.f32.mrb[23].mxu1  ;;  %983 = vadd.xlane.f32.xlu1 %v982_v9  ;;  %v970_v17 = vadd.f32 %v1670_v8, %v1903_v38  ;;  %v991_v20 = vsel %vm53_vm0, %v967_v13, 0.0  ;;  %v2156_v8 = vadd.f32 %v2081_v30, %v2135_v59  ;;  %v2173_v30 = vadd.f32 %v2085_v54, %v2135_v59 }
 0x4e7   :  { %v962_v15 = vadd.f32 %v961_v12, %v1903_v38  ;;  %v985_v16 = vsel %vm53_vm0, %v959_v7, 0.0  ;;  %v2161_v12 = vadd.f32 %v2075_v51, %v2135_v59 }
 0x4e8   :  { %986 = vadd.xlane.f32.xlu0 %v985_v16  ;;  %v994_v21 = vsel %vm273_vm4, %v970_v17, 0.0  ;;  %v2179_v16 = vadd.f32 %v2089_v56, %v2135_v59  ;;  %v615_v54 = vsel %vm53_vm0, %v2173_v30, 0.0 }
 0x4e9   :  { %v988_v18 = vsel %vm53_vm0, %v962_v15, 0.0  ;;  %v609_v51 = vsel %vm53_vm0, %v2161_v12, 0.0 }
 0x4ea   :  { %989 = vadd.xlane.f32.xlu1 %v988_v18  ;;  %v2191_v18 = vadd.f32 %v2087_v55, %v2135_v59  ;;  %v618_v56 = vsel %vm53_vm0, %v2179_v16, 0.0  ;;  %v1719_v55 = vld [vmem:[%s2559_s4 + $0x8] sm:$0xff]  }
 0x4ec   :  { %992 = vadd.xlane.f32.xlu0 %v991_v20 }
 0x4ee   :  { %995 = vadd.xlane.f32.xlu1 %v994_v21  ;;  %v1718_v21 = vld [vmem:[%s2559_s4] sm:$0xff]  }
 0x4ef   :  { %1671 = vmatprep.subr.bf16.mxu0 %v1718_v21 }
 0x4f0   :  { %1672 = vmatpush3.bf16.msra.mxu0 %v1718_v21 }
 0x4f1   :  { %1673 = vmatprep.subr.bf16.mxu0 %v1719_v55 }
 0x4f4   :  { %1674 = vmatpush3.bf16.msra.mxu0 %v1719_v55 }
 0x56d   :  { %v975_v22 = vpop.xlane.xlu0 %974 }
 0x56e   :  { %v997_v4 = vmul.f32 0.03125, %v975_v22 }
 0x56f   :  { %v978_v23 = vpop.xlane.xlu1 %977 }
 0x570   :  { %v2107_v25 = vsub.f32 %v943_v58, %v997_v4  ;;  %v998_v27 = vmul.f32 0.03125, %v978_v23 }
 0x571   :  { %v981_v28 = vpop.xlane.xlu0 %980 }
 0x572   :  { %v2109_v29 = vsub.f32 %v946_v62, %v998_v27  ;;  %v999_v31 = vmul.f32 0.03125, %v981_v28  ;;  %v1013_v38 = vmul.f32 %v2107_v25, %v2107_v25 }
 0x573   :  { %v984_v32 = vpop.xlane.xlu1 %983 }
 0x574   :  { %v2113_v11 = vsub.f32 %v951_v61, %v999_v31  ;;  %v1000_v3 = vmul.f32 0.03125, %v984_v32  ;;  %v1021_v33 = vsel %vm53_vm0, %v1013_v38, 0.0  ;;  %v1014_v36 = vmul.f32 %v2109_v29, %v2109_v29 }
 0x575   :  { %1022 = vadd.xlane.f32.xlu0 %v1021_v33  ;;  %v987_v39 = vpop.xlane.xlu0 %986 }
 0x576   :  { %v2118_v40 = vsub.f32 %v954_v63, %v1000_v3  ;;  %v1001_v41 = vmul.f32 0.03125, %v987_v39  ;;  %v1024_v42 = vsel %vm53_vm0, %v1014_v36, 0.0  ;;  %v1015_v43 = vmul.f32 %v2113_v11, %v2113_v11 }
 0x577   :  { %1025 = vadd.xlane.f32.xlu1 %v1024_v42  ;;  %v990_v44 = vpop.xlane.xlu1 %989 }
 0x578   :  { %v2124_v46 = vsub.f32 %v959_v7, %v1001_v41  ;;  %v1002_v19 = vmul.f32 0.03125, %v990_v44  ;;  %v1027_v47 = vsel %vm53_vm0, %v1015_v43, 0.0  ;;  %v1016_v48 = vmul.f32 %v2118_v40, %v2118_v40 }
 0x579   :  { %1028 = vadd.xlane.f32.xlu0 %v1027_v47  ;;  %v993_v49 = vpop.xlane.xlu0 %992 }
 0x57a   :  { %v2129_v50 = vsub.f32 %v962_v15, %v1002_v19  ;;  %v1003_v34 = vmul.f32 0.03125, %v993_v49  ;;  %v1030_v57 = vsel %vm53_vm0, %v1016_v48, 0.0  ;;  %v1017_v58 = vmul.f32 %v2124_v46, %v2124_v46 }
 0x57b   :  { %1031 = vadd.xlane.f32.xlu1 %v1030_v57  ;;  %v996_v60 = vpop.xlane.xlu1 %995  ;;  %v606_v15 = vsel %vm53_vm0, %v2156_v8, 0.0 }
 0x57c   :  { %v2137_v61 = vsub.f32 %v967_v13, %v1003_v34  ;;  %v1004_v62 = vmul.f32 0.03125, %v996_v60  ;;  %v1033_v45 = vsel %vm53_vm0, %v1017_v58, 0.0  ;;  %v1018_v63 = vmul.f32 %v2129_v50, %v2129_v50 }
 0x57d   :  { %1034 = vadd.xlane.f32.xlu0 %v1033_v45  ;;  %v2167_v13 = vadd.f32 %v2079_v24, %v2135_v59 }
 0x57e   :  { %v2142_v0 = vsub.f32 %v970_v17, %v1004_v62  ;;  %v1036_v1 = vsel %vm53_vm0, %v1018_v63, 0.0  ;;  %v1019_v5 = vmul.f32 %v2137_v61, %v2137_v61  ;;  %v2185_v17 = vadd.f32 %v2083_v53, %v2135_v59 }
 0x57f   :  { %1037 = vadd.xlane.f32.xlu1 %v1036_v1  ;;  %v612_v24 = vsel %vm53_vm0, %v2167_v13, 0.0  ;;  %v624_v53 = vsel %vm273_vm4, %v2191_v18, 0.0 }
 0x580   :  { %v1039_v6 = vsel %vm53_vm0, %v1019_v5, 0.0  ;;  %v1020_v7 = vmul.f32 %v2142_v0, %v2142_v0  ;;  %v621_v20 = vsel %vm53_vm0, %v2185_v17, 0.0 }
 0x581   :  { %1040 = vadd.xlane.f32.xlu0 %v1039_v6 }
 0x582   :  { %v1042_v9 = vsel %vm273_vm4, %v1020_v7, 0.0 }
 0x583   :  { %1043 = vadd.xlane.f32.xlu1 %v1042_v9 }
 0x585   :  { %604 = vadd.xlane.f32.xlu0 %v603_v52 }
 0x587   :  { %607 = vadd.xlane.f32.xlu1 %v606_v15 }
 0x589   :  { %610 = vadd.xlane.f32.xlu0 %v609_v51 }
 0x58b   :  { %613 = vadd.xlane.f32.xlu1 %v612_v24 }
 0x58d   :  { %616 = vadd.xlane.f32.xlu0 %v615_v54 }
 0x58f   :  { %619 = vadd.xlane.f32.xlu1 %v618_v56 }
 0x591   :  { %622 = vadd.xlane.f32.xlu0 %v621_v20 }
 0x593   :  { %625 = vadd.xlane.f32.xlu1 %v624_v53 }
 0x602   :  { %v1023_v22 = vpop.xlane.xlu0 %1022 }
 0x603   :  { %v1045_v4 = vmul.f32 0.03125, %v1023_v22 }
 0x604   :  { %v1026_v23 = vpop.xlane.xlu1 %1025 }
 0x605   :  { %v1053_v27 = vadd.f32 1e-05, %v1045_v4  ;;  %v1046_v28 = vmul.f32 0.03125, %v1026_v23 }
 0x606   :  { %v1029_v31 = vpop.xlane.xlu0 %1028 }
 0x607   :  { %1740 = vrsqrt.f32 %v1053_v27  ;;  %v1054_v38 = vadd.f32 1e-05, %v1046_v28  ;;  %v1047_v32 = vmul.f32 0.03125, %v1029_v31 }
 0x608   :  { %v1032_v3 = vpop.xlane.xlu1 %1031 }
 0x609   :  { %1742 = vrsqrt.f32 %v1054_v38  ;;  %v1055_v33 = vadd.f32 1e-05, %v1047_v32  ;;  %v1048_v36 = vmul.f32 0.03125, %v1032_v3 }
 0x60a   :  { %v1035_v39 = vpop.xlane.xlu0 %1034 }
 0x60b   :  { %1744 = vrsqrt.f32 %v1055_v33  ;;  %v1056_v41 = vadd.f32 1e-05, %v1048_v36  ;;  %v1049_v42 = vmul.f32 0.03125, %v1035_v39 }
 0x60c   :  { %v1038_v43 = vpop.xlane.xlu1 %1037 }
 0x60d   :  { %1746 = vrsqrt.f32 %v1056_v41  ;;  %v1057_v10 = vadd.f32 1e-05, %v1049_v42  ;;  %v1050_v44 = vmul.f32 0.03125, %v1038_v43 }
 0x60e   :  { %v1041_v19 = vpop.xlane.xlu0 %1040 }
 0x60f   :  { %1748 = vrsqrt.f32 %v1057_v10  ;;  %v1058_v47 = vadd.f32 1e-05, %v1050_v44  ;;  %v1051_v48 = vmul.f32 0.03125, %v1041_v19  ;;  %v1720_v19 = vld [vmem:[%s2560_s3] sm:$0xff]  }
 0x610   :  { %v1044_v49 = vpop.xlane.xlu1 %1043  ;;  %1691 = vmatprep.mubr.msk.bf16.mxu1 %vm167_vm1, %v1720_v19 }
 0x611   :  { %v1741_v34 = vpop.eup %1740  ;;  %1750 = vrsqrt.f32 %v1058_v47  ;;  %v1059_v57 = vadd.f32 1e-05, %v1051_v48  ;;  %v1052_v58 = vmul.f32 0.03125, %v1044_v49 }
 0x612   :  { %v1069_v60 = vmul.f32 %v1741_v34, %v2107_v25 }
 0x613   :  { %v1743_v62 = vpop.eup %1742  ;;  %1752 = vrsqrt.f32 %v1059_v57  ;;  %v1060_v45 = vadd.f32 1e-05, %v1052_v58 }
 0x614   :  { %v1070_v63 = vmul.f32 %v1743_v62, %v2109_v29  ;;  %v1077_v1 = vmul.f32 %v1069_v60, %v1975_v2 }
 0x615   :  { %v1745_v5 = vpop.eup %1744  ;;  %1754 = vrsqrt.f32 %v1060_v45 }
 0x616   :  { %v1071_v6 = vmul.f32 %v1745_v5, %v2113_v11  ;;  %v1078_v7 = vmul.f32 %v1070_v63, %v1975_v2  ;;  %v1085_v9 = vadd.f32 %v1077_v1, %v1980_v14  ;;  %v1721_v5 = vld [vmem:[%s2560_s3 + $0x8] sm:$0xff]  }
 0x617   :  { %v1747_v52 = vpop.eup %1746 }
 0x618   :  { %v1079_v15 = vmul.f32 %v1071_v6, %v1975_v2  ;;  %v1072_v25 = vmul.f32 %v1747_v52, %v2118_v40  ;;  %v1086_v51 = vadd.f32 %v1078_v7, %v1980_v14  ;;  %v1093_v54 = vmax.f32 %v1085_v9, 0.0  ;;  %v1722_v6 = vld [vmem:[%s2560_s3 + $0x10] sm:$0xff]   ;;  %v605_v7 = vpop.xlane.xlu0 %604  ;;  %v608_v52 = vpop.xlane.xlu1 %607 }
 0x619   :  { %v1749_v24 = vpop.eup %1748 }
 0x61a   :  { %v1087_v29 = vadd.f32 %v1079_v15, %v1980_v14  ;;  %v1080_v56 = vmul.f32 %v1072_v25, %v1975_v2  ;;  %v1073_v20 = vmul.f32 %v1749_v24, %v2124_v46  ;;  %v1094_v11 = vmax.f32 %v1086_v51, 0.0 }
 0x61b   :  { %v1751_v53 = vpop.eup %1750 }
 0x61c   :  { %v1088_v21 = vadd.f32 %v1080_v56, %v1980_v14  ;;  %v1074_v55 = vmul.f32 %v1751_v53, %v2129_v50  ;;  %v1101_v22 = vpack.c.bf16 %v1094_v11, %v1093_v54  ;;  %v1081_v40 = vmul.f32 %v1073_v20, %v1975_v2  ;;  %v611_v20 = vpop.xlane.xlu0 %610 }
 0x61d   :  { %v1753_v4 = vpop.eup %1752  ;;  %v1095_v23 = vmax.f32 %v1087_v29, 0.0 }
 0x61e   :  { %v1096_v27 = vmax.f32 %v1088_v21, 0.0  ;;  %v1075_v28 = vmul.f32 %v1753_v4, %v2137_v61  ;;  %1675 = vmatprep.mubr.msk.bf16.mxu0 %vm53_vm0, %v1101_v22  ;;  %v1082_v31 = vmul.f32 %v1074_v55, %v1975_v2  ;;  %v1089_v46 = vadd.f32 %v1081_v40, %v1980_v14  ;;  %v614_v55 = vpop.xlane.xlu1 %613 }
 0x61f   :  { %v1755_v38 = vpop.eup %1754  ;;  %v627_v21 = vmul.f32 0.03125, %v605_v7 }
 0x620   :  { %v1076_v32 = vmul.f32 %v1755_v38, %v2142_v0  ;;  %v1102_v3 = vpack.c.bf16 %v1096_v27, %v1095_v23  ;;  %v1090_v50 = vadd.f32 %v1082_v31, %v1980_v14  ;;  %v1083_v33 = vmul.f32 %v1075_v28, %v1975_v2 }
 0x621   :  { %v1097_v36 = vmax.f32 %v1089_v46, 0.0  ;;  %v628_v27 = vmul.f32 0.03125, %v608_v52  ;;  %v2274_v38 = vsub.f32 %v2149_v37, %v627_v21  ;;  %v617_v46 = vpop.xlane.xlu0 %616 }
 0x622   :  { %1676 = vmatmul.mubr.msk.bf16.vlgmr.msra.gmra.mrb[24].mxu0 %vm53_vm0, %v1102_v3  ;;  %v1098_v39 = vmax.f32 %v1090_v50, 0.0  ;;  %v1084_v61 = vmul.f32 %v1076_v32, %v1975_v2  ;;  %v1091_v41 = vadd.f32 %v1083_v33, %v1980_v14  ;;  %v629_v3 = vmul.f32 0.03125, %v611_v20 }
 0x624   :  { %v1103_v42 = vpack.c.bf16 %v1098_v39, %v1097_v36  ;;  %v1092_v43 = vadd.f32 %v1084_v61, %v1980_v14  ;;  %v1099_v10 = vmax.f32 %v1091_v41, 0.0  ;;  %v620_v39 = vpop.xlane.xlu1 %619  ;;  %v2285_v61 = vsub.f32 %v2156_v8, %v628_v27 }
 0x625   :  { %v630_v41 = vmul.f32 0.03125, %v614_v55  ;;  %v623_v8 = vpop.xlane.xlu0 %622 }
 0x626   :  { %1679 = vmatprep.mubr.msk.bf16.mxu0 %vm53_vm0, %v1103_v42  ;;  %v1100_v0 = vmax.f32 %v1092_v43, 0.0  ;;  %v2293_v43 = vsub.f32 %v2161_v12, %v629_v3  ;;  %v644_v12 = vmul.f32 %v2285_v61, %v2285_v61 }
 0x627   :  { %v2300_v19 = vsub.f32 %v2167_v13, %v630_v41 }
 0x628   :  { %v1104_v44 = vpack.c.bf16 %v1100_v0, %v1099_v10  ;;  %v631_v10 = vmul.f32 0.03125, %v617_v46 }
 0x62a   :  { %1680 = vmatmul.mubr.msk.bf16.gmra.mrb[28].mxu0 %vm53_vm0, %v1104_v44  ;;  %v643_v44 = vmul.f32 %v2274_v38, %v2274_v38 }
 0x6f5   :  { %v1677_v47 = vpop.f32.mrb[24].mxu0 }
 0x6f6   :  { %v1167_v2 = vpop.f32.mrb[25].mxu0 }
 0x6f7   :  { %v1678_v48 = vpop.f32.mrb[26].mxu0 }
 0x6f8   :  { %v1207_v49 = vpack.c.bf16 %v1678_v48, %v1677_v47  ;;  %v1170_v34 = vpop.f32.mrb[27].mxu0  ;;  %v2307_v48 = vsub.f32 %v2173_v30, %v631_v10 }
 0x6f9   :  { %v1206_v57 = vpack.c.bf16 %v1170_v34, %v1167_v2  ;;  %v626_v2 = vpop.xlane.xlu1 %625  ;;  %v651_v34 = vsel %vm53_vm0, %v643_v44, 0.0 }
 0x6fb   :  { %1683 = vmatprep.subr.bf16.mxu1 %v1206_v57 }
 0x6fc   :  { %1684 = vmatpush3.bf16.msra.mxu1 %v1206_v57  ;;  %v645_v57 = vmul.f32 %v2293_v43, %v2293_v43 }
 0x6fd   :  { %v1681_v14 = vpop.f32.mrb[28].mxu0  ;;  %1685 = vmatprep.subr.bf16.mxu1 %v1207_v49 }
 0x6fe   :  { %v1183_v58 = vpop.f32.mrb[29].mxu0 }
 0x6ff   :  { %v1682_v60 = vpop.f32.mrb[30].mxu0 }
 0x700   :  { %v1209_v62 = vpack.c.bf16 %v1682_v60, %v1681_v14  ;;  %v1186_v45 = vpop.f32.mrb[31].mxu0  ;;  %1686 = vmatpush3.bf16.msra.mxu1 %v1207_v49  ;;  %v633_v49 = vmul.f32 0.03125, %v623_v8  ;;  %v634_v14 = vmul.f32 0.03125, %v626_v2  ;;  %v646_v60 = vmul.f32 %v2300_v19, %v2300_v19 }
 0x701   :  { %v1208_v63 = vpack.c.bf16 %v1186_v45, %v1183_v58  ;;  %v654_v58 = vsel %vm53_vm0, %v644_v12, 0.0  ;;  %v647_v45 = vmul.f32 %v2307_v48, %v2307_v48 }
 0x702   :  { %v1243_v1 = vand.u32 %v1209_v62, %v1879_v26  ;;  %v1723_v26 = vld [vmem:[%s2560_s3 + $0x18] sm:$0x1f]   ;;  %v2319_v30 = vsub.f32 %v2185_v17, %v633_v49  ;;  %v657_v62 = vsel %vm53_vm0, %v645_v57, 0.0 }
 0x703   :  { %1687 = vmatprep.subr.bf16.mxu1 %v1208_v63 }
 0x704   :  { %1688 = vmatpush3.bf16.msra.mxu1 %v1208_v63  ;;  %v2325_v63 = vsub.f32 %v2191_v18, %v634_v14  ;;  %v649_v17 = vmul.f32 %v2319_v30, %v2319_v30 }
 0x705   :  { %1689 = vmatprep.subr.bf16.mxu1 %v1243_v1 }
 0x706   :  { %v669_v18 = vsel %vm53_vm0, %v649_v17, 0.0 }
 0x708   :  { %1690 = vmatpush3.bf16.msra.mxu1 %v1243_v1 }
 0x70b   :  { %1692 = vmatmul.mubr.msk.bf16.vlgmr.msra.gmra.mrb[24].mxu1 %vm167_vm1, %v1721_v5  ;;  %v663_v5 = vsel %vm53_vm0, %v647_v45, 0.0 }
 0x70c   :  { %1695 = vmatprep.mubr.msk.bf16.mxu1 %vm167_vm1, %v1722_v6 }
 0x713   :  { %1696 = vmatmul.mubr.msk.bf16.gmra.mrb[28].mxu1 %vm167_vm1, %v1723_v26  ;;  %v650_v26 = vmul.f32 %v2325_v63, %v2325_v63 }
 0x715   :  { %v672_v7 = vsel %vm273_vm4, %v650_v26, 0.0 }
 0x7de   :  { %v1693_v9 = vpop.f32.mrb[24].mxu1 }
 0x7df   :  { %v2251_v15 = vadd.f32 %v1693_v9, %v2135_v59  ;;  %v1279_v25 = vpop.f32.mrb[25].mxu1 }
 0x7e0   :  { %v1694_v51 = vpop.f32.mrb[26].mxu1  ;;  %v2254_v24 = vadd.f32 %v1279_v25, %v2135_v59 }
 0x7e1   :  { %v2257_v54 = vadd.f32 %v1694_v51, %v2135_v59  ;;  %v1282_v29 = vpop.f32.mrb[27].mxu1  ;;  %v1316_v56 = vsel %vm53_vm0, %v2251_v15, 0.0 }
 0x7e2   :  { %1317 = vadd.xlane.f32.xlu0 %v1316_v56  ;;  %v2262_v11 = vadd.f32 %v1282_v29, %v2135_v59  ;;  %v1310_v22 = vsel %vm53_vm0, %v2254_v24, 0.0 }
 0x7e3   :  { %v1319_v53 = vsel %vm53_vm0, %v2257_v54, 0.0 }
 0x7e4   :  { %1320 = vadd.xlane.f32.xlu1 %v1319_v53  ;;  %v1313_v23 = vsel %vm53_vm0, %v2262_v11, 0.0 }
 0x7e6   :  { %v1697_v4 = vpop.f32.mrb[28].mxu1  ;;  %1311 = vadd.xlane.f32.xlu0 %v1310_v22 }
 0x7e7   :  { %v1295_v40 = vpop.f32.mrb[29].mxu1  ;;  %v2277_v50 = vadd.f32 %v1697_v4, %v2135_v59 }
 0x7e8   :  { %v2271_v28 = vadd.f32 %v1295_v40, %v2135_v59  ;;  %v1698_v31 = vpop.f32.mrb[30].mxu1  ;;  %1314 = vadd.xlane.f32.xlu1 %v1313_v23 }
 0x7e9   :  { %v1298_v32 = vpop.f32.mrb[31].mxu1  ;;  %v2288_v37 = vadd.f32 %v1698_v31, %v2135_v59  ;;  %v1328_v0 = vsel %vm53_vm0, %v2277_v50, 0.0 }
 0x7ea   :  { %v2280_v33 = vadd.f32 %v1298_v32, %v2135_v59  ;;  %v1322_v36 = vsel %vm53_vm0, %v2271_v28, 0.0  ;;  %v632_v59 = vmul.f32 0.03125, %v620_v39 }
 0x7eb   :  { %1323 = vadd.xlane.f32.xlu0 %v1322_v36  ;;  %v1331_v47 = vsel %vm273_vm4, %v2288_v37, 0.0 }
 0x7ec   :  { %v1325_v42 = vsel %vm53_vm0, %v2280_v33, 0.0  ;;  %v2313_v13 = vsub.f32 %v2179_v16, %v632_v59  ;;  %v660_v16 = vsel %vm53_vm0, %v646_v60, 0.0 }
 0x7ed   :  { %1326 = vadd.xlane.f32.xlu1 %v1325_v42 }
 0x7ee   :  { %v648_v1 = vmul.f32 %v2313_v13, %v2313_v13 }
 0x7ef   :  { %1329 = vadd.xlane.f32.xlu0 %v1328_v0 }
 0x7f0   :  { %v666_v6 = vsel %vm53_vm0, %v648_v1, 0.0 }
 0x7f1   :  { %1332 = vadd.xlane.f32.xlu1 %v1331_v47 }
 0x7f3   :  { %652 = vadd.xlane.f32.xlu0 %v651_v34 }
 0x7f5   :  { %655 = vadd.xlane.f32.xlu1 %v654_v58 }
 0x7f7   :  { %658 = vadd.xlane.f32.xlu0 %v657_v62 }
 0x7f9   :  { %661 = vadd.xlane.f32.xlu1 %v660_v16 }
 0x7fb   :  { %664 = vadd.xlane.f32.xlu0 %v663_v5 }
 0x7fd   :  { %667 = vadd.xlane.f32.xlu1 %v666_v6 }
 0x7ff   :  { %670 = vadd.xlane.f32.xlu0 %v669_v18 }
 0x801   :  { %673 = vadd.xlane.f32.xlu1 %v672_v7  ;;  %v709_v7 = vsub.s32 4, %v1894_v35 }
 0x86f   :  { %v1318_v9 = vpop.xlane.xlu0 %1317 }
 0x870   :  { %v1336_v52 = vmul.f32 0.03125, %v1318_v9 }
 0x871   :  { %v1321_v25 = vpop.xlane.xlu1 %1320 }
 0x872   :  { %v2339_v51 = vsub.f32 %v2251_v15, %v1336_v52  ;;  %v1337_v29 = vmul.f32 0.03125, %v1321_v25 }
 0x873   :  { %v1312_v56 = vpop.xlane.xlu0 %1311 }
 0x874   :  { %v2342_v20 = vsub.f32 %v2257_v54, %v1337_v29  ;;  %v1334_v53 = vmul.f32 0.03125, %v1312_v56  ;;  %v1352_v21 = vmul.f32 %v2339_v51, %v2339_v51  ;;  %v721_v29 = vsub.s32 5, %v1894_v35 }
 0x875   :  { %v1315_v55 = vpop.xlane.xlu1 %1314 }
 0x876   :  { %v2347_v22 = vsub.f32 %v2254_v24, %v1334_v53  ;;  %v1335_v4 = vmul.f32 0.03125, %v1315_v55  ;;  %v1364_v40 = vsel %vm53_vm0, %v1352_v21, 0.0  ;;  %v1353_v15 = vmul.f32 %v2342_v20, %v2342_v20  ;;  %v1788_v55 = vld [vmem:[%s2558_s5] sm:$0x3f] }
 0x877   :  { %1365 = vadd.xlane.f32.xlu0 %v1364_v40 }
 0x878   :  { %v2353_v23 = vsub.f32 %v2262_v11, %v1335_v4  ;;  %v1324_v54 = vpop.xlane.xlu0 %1323  ;;  %v1367_v27 = vsel %vm53_vm0, %v1353_v15, 0.0  ;;  %v1350_v31 = vmul.f32 %v2347_v22, %v2347_v22  ;;  %v2391_v4 = vrot.slane %v1788_v55, %v709_v7 }
 0x879   :  { %v1338_v46 = vmul.f32 0.03125, %v1324_v54  ;;  %1368 = vadd.xlane.f32.xlu1 %v1367_v27 }
 0x87a   :  { %v1327_v24 = vpop.xlane.xlu1 %1326  ;;  %v1358_v32 = vsel %vm53_vm0, %v1350_v31, 0.0  ;;  %v1351_v3 = vmul.f32 %v2353_v23, %v2353_v23  ;;  %v2393_v31 = vrot.slane %v1788_v55, %v721_v29 }
 0x87b   :  { %v2362_v36 = vsub.f32 %v2271_v28, %v1338_v46  ;;  %v1339_v39 = vmul.f32 0.03125, %v1327_v24  ;;  %1359 = vadd.xlane.f32.xlu0 %v1358_v32 }
 0x87c   :  { %v1330_v11 = vpop.xlane.xlu0 %1329  ;;  %v1361_v41 = vsel %vm53_vm0, %v1351_v3, 0.0 }
 0x87d   :  { %v2366_v42 = vsub.f32 %v2280_v33, %v1339_v39  ;;  %v1340_v10 = vmul.f32 0.03125, %v1330_v11  ;;  %1362 = vadd.xlane.f32.xlu1 %v1361_v41  ;;  %v1354_v0 = vmul.f32 %v2362_v36, %v2362_v36 }
 0x87e   :  { %v1333_v44 = vpop.xlane.xlu1 %1332 }
 0x87f   :  { %v2371_v8 = vsub.f32 %v2277_v50, %v1340_v10  ;;  %v1341_v59 = vmul.f32 0.03125, %v1333_v44  ;;  %v1370_v28 = vsel %vm53_vm0, %v1354_v0, 0.0  ;;  %v1355_v47 = vmul.f32 %v2366_v42, %v2366_v42 }
 0x880   :  { %1371 = vadd.xlane.f32.xlu0 %v1370_v28  ;;  %v653_v12 = vpop.xlane.xlu0 %652 }
 0x881   :  { %v2377_v33 = vsub.f32 %v2288_v37, %v1341_v59  ;;  %v675_v2 = vmul.f32 0.03125, %v653_v12  ;;  %v1373_v49 = vsel %vm53_vm0, %v1355_v47, 0.0  ;;  %v1356_v34 = vmul.f32 %v2371_v8, %v2371_v8 }
 0x882   :  { %1374 = vadd.xlane.f32.xlu1 %v1373_v49  ;;  %v656_v50 = vpop.xlane.xlu1 %655 }
 0x883   :  { %v683_v57 = vadd.f32 1e-05, %v675_v2  ;;  %v676_v14 = vmul.f32 0.03125, %v656_v50  ;;  %v1376_v58 = vsel %vm53_vm0, %v1356_v34, 0.0  ;;  %v1357_v60 = vmul.f32 %v2377_v33, %v2377_v33 }
 0x884   :  { %1377 = vadd.xlane.f32.xlu0 %v1376_v58  ;;  %v659_v62 = vpop.xlane.xlu0 %658 }
 0x885   :  { %1756 = vrsqrt.f32 %v683_v57  ;;  %v684_v37 = vadd.f32 1e-05, %v676_v14  ;;  %v677_v45 = vmul.f32 0.03125, %v659_v62  ;;  %v1379_v16 = vsel %vm273_vm4, %v1357_v60, 0.0 }
 0x886   :  { %1380 = vadd.xlane.f32.xlu1 %v1379_v16  ;;  %v662_v1 = vpop.xlane.xlu1 %661 }
 0x887   :  { %1758 = vrsqrt.f32 %v684_v37  ;;  %v685_v5 = vadd.f32 1e-05, %v677_v45  ;;  %v678_v17 = vmul.f32 0.03125, %v662_v1 }
 0x888   :  { %v665_v6 = vpop.xlane.xlu0 %664 }
 0x889   :  { %1760 = vrsqrt.f32 %v685_v5  ;;  %v686_v26 = vadd.f32 1e-05, %v678_v17  ;;  %v679_v18 = vmul.f32 0.03125, %v665_v6  ;;  %v1792_v6 = vld [vmem:[%s2556_s0 + $0x18] sm:$0xff] }
 0x88a   :  { %v668_v9 = vpop.xlane.xlu1 %667 }
 0x88b   :  { %1762 = vrsqrt.f32 %v686_v26  ;;  %v687_v52 = vadd.f32 1e-05, %v679_v18  ;;  %v680_v25 = vmul.f32 0.03125, %v668_v9 }
 0x88c   :  { %v671_v56 = vpop.xlane.xlu0 %670 }
 0x88d   :  { %1764 = vrsqrt.f32 %v687_v52  ;;  %v688_v53 = vadd.f32 1e-05, %v680_v25  ;;  %v681_v21 = vmul.f32 0.03125, %v671_v56  ;;  %v1793_v56 = vld [vmem:[%s2556_s0 + $0x20] sm:$0xff] }
 0x88e   :  { %v674_v40 = vpop.xlane.xlu1 %673 }
 0x88f   :  { %v1757_v15 = vpop.eup %1756  ;;  %1766 = vrsqrt.f32 %v688_v53  ;;  %v689_v54 = vadd.f32 1e-05, %v681_v21  ;;  %v682_v27 = vmul.f32 0.03125, %v674_v40 }
 0x890   :  { %v699_v46 = vmul.f32 %v1757_v15, %v2274_v38  ;;  %v1795_v15 = vld [vmem:[%s2556_s0 + $0x30] sm:$0xff] }
 0x891   :  { %v1759_v35 = vpop.eup %1758  ;;  %1768 = vrsqrt.f32 %v689_v54  ;;  %v690_v24 = vadd.f32 1e-05, %v682_v27 }
 0x892   :  { %v711_v32 = vmul.f32 %v2391_v4, %v699_v46  ;;  %v700_v3 = vmul.f32 %v1759_v35, %v2285_v61  ;;  %v1789_v61 = vld [vmem:[%s2556_s0] sm:$0xff]  ;;  %v1796_v46 = vld [vmem:[%s2556_s0 + $0x38] sm:$0x1] }
 0x893   :  { %v1761_v39 = vpop.eup %1760  ;;  %1770 = vrsqrt.f32 %v690_v24 }
 0x894   :  { %v723_v11 = vadd.f32 %v2393_v31, %v711_v32  ;;  %v712_v41 = vmul.f32 %v2391_v4, %v700_v3  ;;  %v701_v10 = vmul.f32 %v1761_v39, %v2293_v43 }
 0x895   :  { %v1763_v0 = vpop.eup %1762 }
 0x896   :  { %v731_v44 = vmax.f32 %v723_v11, 0.0  ;;  %v724_v59 = vadd.f32 %v2393_v31, %v712_v41  ;;  %v713_v38 = vmul.f32 %v2391_v4, %v701_v10  ;;  %v702_v28 = vmul.f32 %v1763_v0, %v2300_v19  ;;  %v1790_v19 = vld [vmem:[%s2556_s0 + $0x8] sm:$0xff] }
 0x897   :  { %v1765_v47 = vpop.eup %1764 }
 0x898   :  { %v739_v12 = vadd.f32 %v1789_v61, %v731_v44  ;;  %v732_v2 = vmax.f32 %v724_v59, 0.0  ;;  %v725_v49 = vadd.f32 %v2393_v31, %v713_v38  ;;  %v714_v34 = vmul.f32 %v2391_v4, %v702_v28 }
 0x899   :  { %v1767_v43 = vpop.eup %1766  ;;  %v703_v50 = vmul.f32 %v1765_v47, %v2307_v48  ;;  %v1791_v48 = vld [vmem:[%s2556_s0 + $0x10] sm:$0xff] }
 0x89a   :  { %747 = vst.msk [vmem:[%s2561_s6] sm:$0xff] %vm53_vm0, %v739_v12  ;;  %v740_v57 = vadd.f32 %v1790_v19, %v732_v2  ;;  %v733_v14 = vmax.f32 %v725_v49, 0.0  ;;  %v726_v58 = vadd.f32 %v2393_v31, %v714_v34  ;;  %v704_v60 = vmul.f32 %v1767_v43, %v2313_v13 }
 0x89b   :  { %v1769_v62 = vpop.eup %1768  ;;  %v715_v37 = vmul.f32 %v2391_v4, %v703_v50 }
 0x89c   :  { %748 = vst.msk [vmem:[%s2561_s6 + $0x8] sm:$0xff] %vm53_vm0, %v740_v57  ;;  %v741_v45 = vadd.f32 %v1791_v48, %v733_v14  ;;  %v734_v16 = vmax.f32 %v726_v58, 0.0  ;;  %v716_v1 = vmul.f32 %v2391_v4, %v704_v60  ;;  %v705_v5 = vmul.f32 %v1769_v62, %v2319_v30 }
 0x89d   :  { %v1771_v17 = vpop.eup %1770  ;;  %v727_v13 = vadd.f32 %v2393_v31, %v715_v37 }
 0x89e   :  { %749 = vst.msk [vmem:[%s2561_s6 + $0x10] sm:$0xff] %vm53_vm0, %v741_v45  ;;  %v742_v26 = vadd.f32 %v1792_v6, %v734_v16  ;;  %v728_v18 = vadd.f32 %v2393_v31, %v716_v1  ;;  %v717_v7 = vmul.f32 %v2391_v4, %v705_v5  ;;  %v706_v9 = vmul.f32 %v1771_v17, %v2325_v63  ;;  %v1794_v63 = vld [vmem:[%s2556_s0 + $0x28] sm:$0xff] }
 0x89f   :  { %v735_v30 = vmax.f32 %v727_v13, 0.0 }
 0x8a0   :  { %750 = vst.msk [vmem:[%s2561_s6 + $0x18] sm:$0xff] %vm53_vm0, %v742_v26  ;;  %v736_v52 = vmax.f32 %v728_v18, 0.0  ;;  %v729_v25 = vadd.f32 %v2393_v31, %v717_v7  ;;  %v718_v29 = vmul.f32 %v2391_v4, %v706_v9 }
 0x8a1   :  { %v743_v53 = vadd.f32 %v1793_v56, %v735_v30 }
 0x8a2   :  { %v744_v21 = vadd.f32 %v1794_v63, %v736_v52  ;;  %v737_v55 = vmax.f32 %v729_v25, 0.0  ;;  %v730_v40 = vadd.f32 %v2393_v31, %v718_v29 }
 0x8a3   :  { %751 = vst.msk [vmem:[%s2561_s6 + $0x20] sm:$0xff] %vm53_vm0, %v743_v53 }
 0x8a4   :  { %752 = vst.msk [vmem:[%s2561_s6 + $0x28] sm:$0xff] %vm53_vm0, %v744_v21  ;;  %v745_v54 = vadd.f32 %v1795_v15, %v737_v55  ;;  %v738_v27 = vmax.f32 %v730_v40, 0.0 }
 0x8a6   :  { %753 = vst.msk [vmem:[%s2561_s6 + $0x30] sm:$0xff] %vm53_vm0, %v745_v54  ;;  %v746_v35 = vadd.f32 %v1796_v46, %v738_v27 }
 0x8a8   :  { %754 = vst.msk [vmem:[%s2561_s6 + $0x38] sm:$0x1] %vm273_vm4, %v746_v35 }
 0x904   :  { %v1366_v24 = vpop.xlane.xlu0 %1365 }
 0x905   :  { %v1384_v32 = vmul.f32 0.03125, %v1366_v24 }
 0x906   :  { %v1369_v3 = vpop.xlane.xlu1 %1368 }
 0x907   :  { %v1392_v39 = vadd.f32 1e-05, %v1384_v32  ;;  %v1385_v11 = vmul.f32 0.03125, %v1369_v3 }
 0x908   :  { %v1360_v41 = vpop.xlane.xlu0 %1359 }
 0x909   :  { %1772 = vrsqrt.f32 %v1392_v39  ;;  %v1393_v10 = vadd.f32 1e-05, %v1385_v11  ;;  %v1382_v0 = vmul.f32 0.03125, %v1360_v41 }
 0x90a   :  { %v1363_v44 = vpop.xlane.xlu1 %1362 }
 0x90b   :  { %1774 = vrsqrt.f32 %v1393_v10  ;;  %v1390_v59 = vadd.f32 1e-05, %v1382_v0  ;;  %v1383_v38 = vmul.f32 0.03125, %v1363_v44 }
 0x90d   :  { %1776 = vrsqrt.f32 %v1390_v59  ;;  %v1391_v28 = vadd.f32 1e-05, %v1383_v38  ;;  %v1372_v47 = vpop.xlane.xlu0 %1371 }
 0x90e   :  { %v1386_v61 = vmul.f32 0.03125, %v1372_v47 }
 0x90f   :  { %1778 = vrsqrt.f32 %v1391_v28  ;;  %v1375_v12 = vpop.xlane.xlu1 %1374 }
 0x910   :  { %v1394_v2 = vadd.f32 1e-05, %v1386_v61  ;;  %v1387_v49 = vmul.f32 0.03125, %v1375_v12 }
 0x911   :  { %v1378_v34 = vpop.xlane.xlu0 %1377 }
 0x912   :  { %1780 = vrsqrt.f32 %v1394_v2  ;;  %v1395_v43 = vadd.f32 1e-05, %v1387_v49  ;;  %v1388_v50 = vmul.f32 0.03125, %v1378_v34 }
 0x913   :  { %v1773_v19 = vpop.eup %1772  ;;  %v1381_v57 = vpop.xlane.xlu1 %1380 }
 0x914   :  { %v1408_v14 = vmul.f32 %v1773_v19, %v2339_v51  ;;  %1782 = vrsqrt.f32 %v1395_v43  ;;  %v1396_v58 = vadd.f32 1e-05, %v1388_v50  ;;  %v1389_v60 = vmul.f32 0.03125, %v1381_v57 }
 0x915   :  { %v1775_v62 = vpop.eup %1774 }
 0x916   :  { %v1416_v37 = vmul.f32 %v1408_v14, %v2391_v4  ;;  %v1409_v48 = vmul.f32 %v1775_v62, %v2342_v20  ;;  %1784 = vrsqrt.f32 %v1396_v58  ;;  %v1397_v45 = vadd.f32 1e-05, %v1389_v60  ;;  %v1797_v20 = vld [vmem:[%s2556_s0 + $0x50] sm:$0xff] }
 0x917   :  { %v1777_v16 = vpop.eup %1776 }
 0x918   :  { %v1424_v1 = vadd.f32 %v1416_v37, %v2393_v31  ;;  %v1417_v5 = vmul.f32 %v1409_v48, %v2391_v4  ;;  %v1406_v17 = vmul.f32 %v1777_v16, %v2347_v22  ;;  %1786 = vrsqrt.f32 %v1397_v45 }
 0x919   :  { %v1779_v13 = vpop.eup %1778 }
 0x91a   :  { %v1432_v51 = vmax.f32 %v1424_v1, 0.0  ;;  %v1425_v6 = vadd.f32 %v1417_v5, %v2393_v31  ;;  %v1414_v26 = vmul.f32 %v1406_v17, %v2391_v4  ;;  %v1407_v18 = vmul.f32 %v1779_v13, %v2353_v23  ;;  %v1798_v23 = vld [vmem:[%s2556_s0 + $0x58] sm:$0xff] }
 0x91c   :  { %v1781_v7 = vpop.eup %1780  ;;  %v1440_v9 = vadd.f32 %v1797_v20, %v1432_v51  ;;  %v1433_v30 = vmax.f32 %v1425_v6, 0.0  ;;  %v1422_v52 = vadd.f32 %v1414_v26, %v2393_v31  ;;  %v1415_v22 = vmul.f32 %v1407_v18, %v2391_v4 }
 0x91d   :  { %v1410_v25 = vmul.f32 %v1781_v7, %v2362_v36  ;;  %v1799_v36 = vld [vmem:[%s2556_s0 + $0x40] sm:$0xff] }
 0x91e   :  { %v1783_v29 = vpop.eup %1782  ;;  %1525 = vst.msk [vmem:[%s2561_s6 + $0x50] sm:$0xff] %vm53_vm0, %v1440_v9  ;;  %v1441_v56 = vadd.f32 %v1798_v23, %v1433_v30  ;;  %v1430_v53 = vmax.f32 %v1422_v52, 0.0  ;;  %v1423_v63 = vadd.f32 %v1415_v22, %v2393_v31 }
 0x91f   :  { %v1418_v21 = vmul.f32 %v1410_v25, %v2391_v4  ;;  %v1411_v55 = vmul.f32 %v1783_v29, %v2366_v42  ;;  %v1800_v42 = vld [vmem:[%s2556_s0 + $0x48] sm:$0xff] }
 0x920   :  { %v1785_v40 = vpop.eup %1784  ;;  %1526 = vst.msk [vmem:[%s2561_s6 + $0x58] sm:$0xff] %vm53_vm0, %v1441_v56  ;;  %v1438_v15 = vadd.f32 %v1799_v36, %v1430_v53  ;;  %v1431_v54 = vmax.f32 %v1423_v63, 0.0 }
 0x921   :  { %v1426_v27 = vadd.f32 %v1418_v21, %v2393_v31  ;;  %v1419_v46 = vmul.f32 %v1411_v55, %v2391_v4  ;;  %v1412_v35 = vmul.f32 %v1785_v40, %v2371_v8  ;;  %v1801_v8 = vld [vmem:[%s2556_s0 + $0x60] sm:$0xff] }
 0x922   :  { %v1787_v24 = vpop.eup %1786  ;;  %1523 = vst.msk [vmem:[%s2561_s6 + $0x40] sm:$0xff] %vm53_vm0, %v1438_v15  ;;  %v1439_v32 = vadd.f32 %v1800_v42, %v1431_v54 }
 0x923   :  { %v1434_v3 = vmax.f32 %v1426_v27, 0.0  ;;  %v1427_v39 = vadd.f32 %v1419_v46, %v2393_v31  ;;  %v1420_v11 = vmul.f32 %v1412_v35, %v2391_v4  ;;  %v1413_v41 = vmul.f32 %v1787_v24, %v2377_v33  ;;  %v1802_v33 = vld [vmem:[%s2556_s0 + $0x68] sm:$0xff] }
 0x924   :  { %1524 = vst.msk [vmem:[%s2561_s6 + $0x48] sm:$0xff] %vm53_vm0, %v1439_v32 }
 0x925   :  { %v1442_v10 = vadd.f32 %v1801_v8, %v1434_v3  ;;  %v1435_v0 = vmax.f32 %v1427_v39, 0.0  ;;  %v1428_v44 = vadd.f32 %v1420_v11, %v2393_v31  ;;  %v1421_v59 = vmul.f32 %v1413_v41, %v2391_v4  ;;  %v1803_v4 = vld [vmem:[%s2556_s0 + $0x70] sm:$0xff] }
 0x927   :  { %1527 = vst.msk [vmem:[%s2561_s6 + $0x60] sm:$0xff] %vm53_vm0, %v1442_v10  ;;  %v1443_v38 = vadd.f32 %v1802_v33, %v1435_v0  ;;  %v1436_v28 = vmax.f32 %v1428_v44, 0.0  ;;  %v1429_v47 = vadd.f32 %v1421_v59, %v2393_v31  ;;  %v1804_v31 = vld [vmem:[%s2556_s0 + $0x78] sm:$0x1] }
 0x929   :  { %1528 = vst.msk [vmem:[%s2561_s6 + $0x68] sm:$0xff] %vm53_vm0, %v1443_v38  ;;  %v1444_v61 = vadd.f32 %v1803_v4, %v1436_v28  ;;  %v1437_v12 = vmax.f32 %v1429_v47, 0.0 }
 0x92b   :  { %1529 = vst.msk [vmem:[%s2561_s6 + $0x70] sm:$0xff] %vm53_vm0, %v1444_v61  ;;  %v1445_v2 = vadd.f32 %v1804_v31, %v1437_v12 }
 0x92d   :  { %1530 = vst.msk [vmem:[%s2561_s6 + $0x78] sm:$0x1] %vm273_vm4, %v1445_v2 }

</bundles_post_ra>
